<compile_context>
chip_gen: v7x
topology: tpu7x:2x2x1
jax: 0.10.0
libtpu: 0.0.40
codegen_flags: <defaults>
</compile_context>

<pallas_src>
import functools

import jax
import jax.numpy as jnp
from jax.experimental import pallas as pl
from jax.experimental.pallas import tpu as pltpu


# ------------------------------ small helpers -------------------------------

def _round_up(x, m):
    return ((x + m - 1) // m) * m


def _pick_tile(dim, candidates):
    for c in candidates:
        if dim % c == 0:
            return c
    return dim


# ----------------------------- Pallas kernels ------------------------------

def _mm_stats_kernel(a_ref, b_ref, y_ref, stats_ref, acc_ref, *, activation):
    """Tiled batched matmul with f32 accumulation + fused per-column stats.

    grid = (j: N tiles, p: parity/batch, i: M tiles, k: K tiles) — K innermost.
    y block index = (p, i, j)   (accumulator across k only)
    stats block index = (p, 0, j) (accumulator across i and k)
    """
    i = pl.program_id(2)
    k = pl.program_id(3)
    nk = pl.num_programs(3)

    @pl.when(k == 0)
    def _():
        acc_ref[...] = jnp.zeros_like(acc_ref)

    @pl.when((i == 0) & (k == 0))
    def _():
        stats_ref[...] = jnp.zeros_like(stats_ref)

    acc_ref[...] += jnp.dot(a_ref[...], b_ref[...],
                            preferred_element_type=jnp.float32)

    @pl.when(k == nk - 1)
    def _():
        acc = acc_ref[...]
        if activation is not None:
            acc = activation(acc)
        y_ref[...] = acc.astype(y_ref.dtype)
        # Per-output-channel sum / sum-of-squares for BatchNorm batch stats
        # (f32, accumulated over all M tiles of this (parity, N-tile) block).
        stats_ref[0:1, :] += jnp.sum(acc, axis=0, keepdims=True)
        stats_ref[1:2, :] += jnp.sum(acc * acc, axis=0, keepdims=True)


def _scale_shift_relu_kernel(y_ref, scale_ref, shift_ref, o_ref):
    # BatchNorm apply (scale/shift precomputed from fused stats) + ReLU.
    # Elementwise math kept in f32 (v5e has no bf16 VALU path).
    y = y_ref[...].astype(jnp.float32)
    o_ref[...] = jnp.maximum(y * scale_ref[...] + shift_ref[...], 0.0
                             ).astype(o_ref.dtype)


# ------------------------------ kernel wrappers ------------------------------

def matmul_bn_stats(a, b, *, activation=None, out_dtype=jnp.bfloat16):
    """Batched tiled matmul y[p] = a[p] @ b[p] with fused column statistics.

    a: (P, M, K), b: (P, K, N).  Operands are cast to bf16; accumulation f32.
    Returns:
      y     : (P, Mpad, Npad) out_dtype, valid region [:, :M, :N]
      stats : (P, 8, Npad) f32 — rows 0/1 hold per-column sum / sum-of-squares
              of parity p's f32 result (padding rows/cols contribute zero).
    """
    P, M, K = a.shape
    Pb, Kb, N = b.shape
    assert P == Pb and K == Kb

    Npad = _round_up(N, 128)                       # lane-dense output columns
    Kpad = _round_up(K, 128)
    if M >= 128:
        Mpad = _round_up(M, 128)
        tm = _pick_tile(Mpad, (512, 256, 128))
    else:
        Mpad = _round_up(M, 8)
        tm = Mpad
    tn = _pick_tile(Npad, (512, 256, 128))
    tk = _pick_tile(Kpad, (512, 256, 128))

    a_p = jnp.pad(a.astype(jnp.bfloat16), ((0, 0), (0, Mpad - M), (0, Kpad - K)))
    b_p = jnp.pad(b.astype(jnp.bfloat16), ((0, 0), (0, Kpad - K), (0, Npad - N)))

    grid = (Npad // tn, P, Mpad // tm, Kpad // tk)
    kernel = functools.partial(_mm_stats_kernel, activation=activation)
    y, stats = pl.pallas_call(
        kernel,
        out_shape=(jax.ShapeDtypeStruct((P, Mpad, Npad), out_dtype),
                   jax.ShapeDtypeStruct((P, 8, Npad), jnp.float32)),
        grid=grid,
        in_specs=[
            pl.BlockSpec((None, tm, tk), lambda j, p, i, k: (p, i, k)),
            pl.BlockSpec((None, tk, tn), lambda j, p, i, k: (p, k, j)),
        ],
        out_specs=(
            pl.BlockSpec((None, tm, tn), lambda j, p, i, k: (p, i, j)),
            pl.BlockSpec((None, 8, tn), lambda j, p, i, k: (p, 0, j)),
        ),
        scratch_shapes=[pltpu.VMEM((tm, tn), jnp.float32)],
        compiler_params=pltpu.CompilerParams(
            # j (N tiles) and p (parity) may be split across TensorCores; the
            # stats block accumulates across i/k, so those stay sequential.
            dimension_semantics=("parallel", "parallel", "arbitrary", "arbitrary"),
            vmem_limit_bytes=32 * 1024 * 1024,   # tiles budgeted well below v7x 64 MiB
        ),
    )(a_p, b_p)
    return y, stats


def bn_relu_apply(y, stats, gamma, beta, n_rows, *, eps=1e-5,
                  out_dtype=jnp.bfloat16):
    """Training-mode BatchNorm (biased variance, eps=1e-5) + ReLU, row-tiled.

    y: (P, Mpad, Npad) from matmul_bn_stats; stats: (P, 8, Npad);
    gamma/beta: (C,) with C <= Npad; n_rows = number of real output pixels.
    """
    P, Mpad, Npad = y.shape
    C = gamma.shape[0]
    s = jnp.sum(stats, axis=0)                     # (8, Npad) f32
    mean = s[0] / n_rows
    var = jnp.maximum(s[1] / n_rows - mean * mean, 0.0)
    gamma_p = jnp.pad(gamma.astype(jnp.float32), (0, Npad - C))
    beta_p = jnp.pad(beta.astype(jnp.float32), (0, Npad - C))
    scale = gamma_p * jax.lax.rsqrt(var + eps)
    shift = beta_p - mean * scale

    rows = P * Mpad
    tm = _pick_tile(rows, (1024, 512, 256, 128, 64, 32, 16, 8))
    out = pl.pallas_call(
        _scale_shift_relu_kernel,
        out_shape=jax.ShapeDtypeStruct((rows, Npad), out_dtype),
        grid=(rows // tm,),
        in_specs=[
            pl.BlockSpec((tm, Npad), lambda i: (i, 0)),
            pl.BlockSpec((1, Npad), lambda i: (0, 0)),
            pl.BlockSpec((1, Npad), lambda i: (0, 0)),
        ],
        out_specs=pl.BlockSpec((tm, Npad), lambda i: (i, 0)),
        compiler_params=pltpu.CompilerParams(
            dimension_semantics=("parallel",)),
    )(y.reshape(rows, Npad), scale.reshape(1, Npad), shift.reshape(1, Npad))
    return out.reshape(P, Mpad, Npad)


# ------------------------------- JAX glue -----------------------------------

def _convt_subpixel_patches(x_nhwc):
    """Sub-pixel im2col for ConvTranspose2d(k=4, s=2, p=1).

    Output pixel (2j+py, 2i+px) only receives the 2x2 kernel taps of parity
    (py, px), so each parity class is a dense matmul with K = 4*Cin over the
    pad-1 input.  Returns (4, B*H*W, 4*Cin), parity p = 2*py + px, tap order
    (dy, dx, cin) matching _convt_subpixel_wmats.
    """
    B, H, W, C = x_nhwc.shape
    xp = jnp.pad(x_nhwc, ((0, 0), (1, 1), (1, 1), (0, 0)))
    parities = []
    for py in range(2):
        for px in range(2):
            taps = []
            for dy in range(2):
                roff = dy if py == 0 else 1 + dy
                for dx in range(2):
                    coff = dx if px == 0 else 1 + dx
                    taps.append(xp[:, roff:roff + H, coff:coff + W, :])
            p = jnp.stack(taps, axis=3)                      # (B, H, W, 4, C)
            parities.append(p.reshape(B * H * W, 4 * C))
    return jnp.stack(parities, axis=0)                       # (4, B*H*W, 4*C)


def _convt_subpixel_wmats(w):
    """PyTorch ConvTranspose2d weight (Cin, Cout, 4, 4) -> (4, 4*Cin, Cout)
    per-parity weight matrices matching _convt_subpixel_patches tap order."""
    cin, cout = w.shape[0], w.shape[1]
    mats = []
    for py in range(2):
        for px in range(2):
            taps = []
            for dy in range(2):
                ky = 3 - 2 * dy if py == 0 else 2 - 2 * dy
                for dx in range(2):
                    kx = 3 - 2 * dx if px == 0 else 2 - 2 * dx
                    taps.append(w[:, :, ky, kx])             # (cin, cout)
            mats.append(jnp.stack(taps, axis=0).reshape(4 * cin, cout))
    return jnp.stack(mats, axis=0)                           # (4, 4*Cin, Cout)


def _conv3x3_patches(x_nhwc):
    """im2col for Conv2d(k=3, s=1, p=1) (extra layers): (1, B*H*W, 9*Cin)."""
    B, H, W, C = x_nhwc.shape
    xp = jnp.pad(x_nhwc, ((0, 0), (1, 1), (1, 1), (0, 0)))
    taps = [xp[:, ky:ky + H, kx:kx + W, :] for ky in range(3) for kx in range(3)]
    p = jnp.stack(taps, axis=3)                              # (B, H, W, 9, C)
    return p.reshape(1, B * H * W, 9 * C)


def _interleave_parity(y4, B, H, W, C):
    """(4, B*H*W, C) parity-stacked outputs -> (B, 2H, 2W, C) NHWC."""
    y4 = y4.reshape(2, 2, B, H, W, C)                        # (py, px, b, j, i, c)
    out = jnp.transpose(y4, (2, 3, 0, 4, 1, 5))              # (b, j, py, i, px, c)
    return out.reshape(B, 2 * H, 2 * W, C)


def init_decoder_params(key, isize, nz, nc, ngf, n_extra_layers=0):
    assert isize % 16 == 0, "isize has to be a multiple of 16"
    cngf, tisize = ngf // 2, 4
    while tisize != isize:
        cngf, tisize = cngf * 2, tisize * 2

    keys = iter(jax.random.split(key, 64))
    params = []

    # initial ConvTranspose2d(nz, cngf, 4, 1, 0) + BN + ReLU
    # weight pre-transformed to (16 taps, nz, cngf): tap t = ky*4 + kx
    w = 0.02 * jax.random.normal(next(keys), (nz, cngf, 4, 4), jnp.float32)
    w_mat = jnp.transpose(w, (2, 3, 0, 1)).reshape(16, nz, cngf)
    params.append(("initial", w_mat,
                   jnp.ones((cngf,), jnp.float32), jnp.zeros((cngf,), jnp.float32)))

    csize = 4
    while csize < isize // 2:
        w = 0.02 * jax.random.normal(next(keys), (cngf, cngf // 2, 4, 4), jnp.float32)
        params.append(("pyramid", _convt_subpixel_wmats(w),
                       jnp.ones((cngf // 2,), jnp.float32),
                       jnp.zeros((cngf // 2,), jnp.float32)))
        cngf, csize = cngf // 2, csize * 2

    for _ in range(n_extra_layers):
        w = 0.02 * jax.random.normal(next(keys), (cngf, cngf, 3, 3), jnp.float32)
        w_mat = jnp.transpose(w, (2, 3, 1, 0)).reshape(9 * cngf, cngf)[None]
        params.append(("extra", w_mat,
                       jnp.ones((cngf,), jnp.float32), jnp.zeros((cngf,), jnp.float32)))

    # final ConvTranspose2d(cngf, nc, 4, 2, 1) + Tanh
    w = 0.02 * jax.random.normal(next(keys), (cngf, nc, 4, 4), jnp.float32)
    params.append(("final", _convt_subpixel_wmats(w), None, None))
    return params


def decoder_forward(z_nchw, params):
    """z_nchw: (B, nz, 1, 1).  Returns NCHW output (B, nc, isize, isize) f32."""
    B, nz = z_nchw.shape[0], z_nchw.shape[1]
    x = None                                   # NHWC bf16 inter-layer activation
    for kind, w_mat, gamma, beta in params:
        if kind == "initial":
            cout = w_mat.shape[2]
            # 1x1 input -> one matmul per (ky,kx) tap: P=16, M=B, K=nz, N=cout.
            a = jnp.broadcast_to(z_nchw.reshape(1, B, nz), (16, B, nz))
            y, stats = matmul_bn_stats(a, w_mat)
            act = bn_relu_apply(y, stats, gamma, beta, n_rows=16 * B)
            act = act[:, :B, :cout]                               # (16, B, cout)
            x = act.reshape(4, 4, B, cout).transpose(2, 0, 1, 3)  # (B, 4, 4, cout)
        elif kind == "pyramid":
            cout = w_mat.shape[2]
            Bx, H, W, _ = x.shape
            patches = _convt_subpixel_patches(x)                  # (4, B*H*W, 4*Cin)
            y, stats = matmul_bn_stats(patches, w_mat)
            act = bn_relu_apply(y, stats, gamma, beta, n_rows=4 * Bx * H * W)
            act = act[:, :Bx * H * W, :cout]
            x = _interleave_parity(act, Bx, H, W, cout)           # (B, 2H, 2W, cout)
        elif kind == "extra":
            cout = w_mat.shape[2]
            Bx, H, W, _ = x.shape
            patches = _conv3x3_patches(x)                         # (1, B*H*W, 9*Cin)
            y, stats = matmul_bn_stats(patches, w_mat)
            act = bn_relu_apply(y, stats, gamma, beta, n_rows=Bx * H * W)
            x = act[0, :Bx * H * W, :cout].reshape(Bx, H, W, cout)
        else:  # final: ConvTranspose(k=4,s=2,p=1) + Tanh fused in the epilogue
            cout = w_mat.shape[2]
            Bx, H, W, _ = x.shape
            patches = _convt_subpixel_patches(x)
            y, _ = matmul_bn_stats(patches, w_mat, activation=jnp.tanh,
                                   out_dtype=jnp.float32)
            yr = y[:, :Bx * H * W, :cout]
            x = _interleave_parity(yr, Bx, H, W, cout)            # f32 NHWC
    return jnp.transpose(x, (0, 3, 1, 2))                         # NCHW like PyTorch


# --------------------------------- main --------------------------------------

if __name__ == "__main__":
    isize, nz, nc, ngf, ngpu = 16, 8, 3, 8, 1
    n_extra_layers = 0
    B = 2

    key = jax.random.PRNGKey(0)
    k_z, k_w = jax.random.split(key)
    z = jax.random.normal(k_z, (B, nz, 1, 1), jnp.float32)

    params = init_decoder_params(k_w, isize, nz, nc, ngf, n_extra_layers)

    out = jax.jit(lambda zz: decoder_forward(zz, params))(z)
    out = jax.block_until_ready(out)

    assert out.shape == (B, nc, isize, isize), out.shape
    assert out.dtype == jnp.float32
    assert bool(jnp.all(jnp.isfinite(out)))
    print("KERNEL_OK")
</pallas_src>

<mosaic_0001>
module attributes {stable_mosaic.version = 11 : i64} {
  func.func @_scale_shift_relu_kernel(%arg0: i32, %arg1: memref<128x128xbf16, #tpu.memory_space<vmem>>, %arg2: memref<1x128xf32, #tpu.memory_space<vmem>>, %arg3: memref<1x128xf32, #tpu.memory_space<vmem>>, %arg4: memref<128x128xbf16, #tpu.memory_space<vmem>>) attributes {dimension_semantics = [#tpu.dimension_semantics<parallel>], iteration_bounds = array<i64: 1>, scalar_prefetch = 0 : i64, scratch_operands = 0 : i64, tpu.core_type = #tpu.core_type<tc>, window_params = [{transform_indices = @transform_0, window_bounds = array<i64: 128, 128>}, {pipeline_mode = #tpu.pipeline_mode<synchronous>, transform_indices = @transform_1, window_bounds = array<i64: 1, 128>}, {pipeline_mode = #tpu.pipeline_mode<synchronous>, transform_indices = @transform_2, window_bounds = array<i64: 1, 128>}, {transform_indices = @transform_3, window_bounds = array<i64: 128, 128>}]} {
    %c0 = arith.constant 0 : index
    %c0_0 = arith.constant 0 : index
    %0 = vector.load %arg1[%c0, %c0_0] : memref<128x128xbf16, #tpu.memory_space<vmem>>, vector<128x128xbf16>
    %1 = arith.extf %0 : vector<128x128xbf16> to vector<128x128xf32>
    %c0_1 = arith.constant 0 : index
    %c0_2 = arith.constant 0 : index
    %2 = vector.load %arg2[%c0_1, %c0_2] : memref<1x128xf32, #tpu.memory_space<vmem>>, vector<1x128xf32>
    %3 = vector.broadcast %2 : vector<1x128xf32> to vector<128x128xf32>
    %4 = arith.mulf %1, %3 : vector<128x128xf32>
    %c0_3 = arith.constant 0 : index
    %c0_4 = arith.constant 0 : index
    %5 = vector.load %arg3[%c0_3, %c0_4] : memref<1x128xf32, #tpu.memory_space<vmem>>, vector<1x128xf32>
    %6 = vector.broadcast %5 : vector<1x128xf32> to vector<128x128xf32>
    %7 = arith.addf %4, %6 : vector<128x128xf32>
    %cst = arith.constant 0.000000e+00 : f32
    %8 = vector.broadcast %cst : f32 to vector<128x128xf32>
    %9 = arith.maximumf %7, %8 : vector<128x128xf32>
    %10 = arith.truncf %9 : vector<128x128xf32> to vector<128x128xbf16>
    %c0_5 = arith.constant 0 : index
    %c0_6 = arith.constant 0 : index
    %11 = vector.load %arg4[%c0_5, %c0_6] : memref<128x128xbf16, #tpu.memory_space<vmem>>, vector<128x128xbf16>
    tpu.vector_store %arg4[%c0_5, %c0_6], %10 {strides = array<i32>} : memref<128x128xbf16, #tpu.memory_space<vmem>>, vector<128x128xbf16>,
    return
  }
  func.func @transform_0(%arg0: i32) -> (i32, i32) {
    %c0_i32 = arith.constant 0 : i32
    %c0_i32_0 = arith.constant 0 : i32
    return %arg0, %c0_i32 : i32, i32
  }
  func.func @transform_1(%arg0: i32) -> (i32, i32) {
    %c0_i32 = arith.constant 0 : i32
    %c0_i32_0 = arith.constant 0 : i32
    %c0_i32_1 = arith.constant 0 : i32
    return %c0_i32, %c0_i32_0 : i32, i32
  }
  func.func @transform_2(%arg0: i32) -> (i32, i32) {
    %c0_i32 = arith.constant 0 : i32
    %c0_i32_0 = arith.constant 0 : i32
    %c0_i32_1 = arith.constant 0 : i32
    return %c0_i32, %c0_i32_0 : i32, i32
  }
  func.func @transform_3(%arg0: i32) -> (i32, i32) {
    %c0_i32 = arith.constant 0 : i32
    %c0_i32_0 = arith.constant 0 : i32
    return %arg0, %c0_i32 : i32, i32
  }
}

module attributes {stable_mosaic.version = 11 : i64} {
  func.func @_mm_stats_kernel(%arg0: i32, %arg1: i32, %arg2: i32, %arg3: i32, %arg4: memref<1x8x128xbf16, #tpu.memory_space<vmem>>, %arg5: memref<1x128x128xbf16, #tpu.memory_space<vmem>>, %arg6: memref<1x8x128xbf16, #tpu.memory_space<vmem>>, %arg7: memref<1x8x128xf32, #tpu.memory_space<vmem>>, %arg8: memref<8x128xf32, #tpu.memory_space<vmem>>) attributes {dimension_semantics = [#tpu.dimension_semantics<parallel>, #tpu.dimension_semantics<parallel>, #tpu.dimension_semantics<arbitrary>, #tpu.dimension_semantics<arbitrary>], iteration_bounds = array<i64: 1, 16, 1, 1>, scalar_prefetch = 0 : i64, scratch_operands = 1 : i64, tpu.core_type = #tpu.core_type<tc>, window_params = [{transform_indices = @transform_0, window_bounds = array<i64: 1, 8, 128>}, {transform_indices = @transform_1, window_bounds = array<i64: 1, 128, 128>}, {transform_indices = @transform_2, window_bounds = array<i64: 1, 8, 128>}, {transform_indices = @transform_3, window_bounds = array<i64: 1, 8, 128>}]} {
    %c0_i32 = arith.constant 0 : i32
    %0 = arith.cmpi eq, %arg3, %c0_i32 : i32
    %1 = arith.extui %0 : i1 to i32
    %c0_i32_0 = arith.constant 0 : i32
    %2 = arith.cmpi ne, %1, %c0_i32_0 : i32
    scf.if %2 {
      %cst_15 = arith.constant 0.000000e+00 : f32
      %19 = vector.broadcast %cst_15 : f32 to vector<8x128xf32>
      %c0_16 = arith.constant 0 : index
      %c0_17 = arith.constant 0 : index
      %20 = vector.load %arg8[%c0_16, %c0_17] : memref<8x128xf32, #tpu.memory_space<vmem>>, vector<8x128xf32>
      tpu.vector_store %arg8[%c0_16, %c0_17], %19 {strides = array<i32>} : memref<8x128xf32, #tpu.memory_space<vmem>>, vector<8x128xf32>,
    } else {
    }
    %c0_i32_1 = arith.constant 0 : i32
    %3 = arith.cmpi eq, %arg2, %c0_i32_1 : i32
    %c0_i32_2 = arith.constant 0 : i32
    %4 = arith.cmpi eq, %arg3, %c0_i32_2 : i32
    %5 = arith.andi %3, %4 : i1
    %6 = arith.extui %5 : i1 to i32
    %c0_i32_3 = arith.constant 0 : i32
    %7 = arith.cmpi ne, %6, %c0_i32_3 : i32
    scf.if %7 {
      %cst_15 = arith.constant 0.000000e+00 : f32
      %19 = vector.broadcast %cst_15 : f32 to vector<8x128xf32>
      %c0_16 = arith.constant 0 : index
      %c0_17 = arith.constant 0 : index
      %c0_18 = arith.constant 0 : index
      %20 = vector.load %arg7[%c0_16, %c0_17, %c0_18] : memref<1x8x128xf32, #tpu.memory_space<vmem>>, vector<1x8x128xf32>
      %21 = vector.shape_cast %20 : vector<1x8x128xf32> to vector<8x128xf32>
      %22 = vector.shape_cast %19 : vector<8x128xf32> to vector<1x8x128xf32>
      tpu.vector_store %arg7[%c0_16, %c0_17, %c0_18], %22 {strides = array<i32>} : memref<1x8x128xf32, #tpu.memory_space<vmem>>, vector<1x8x128xf32>,
    } else {
    }
    %c0 = arith.constant 0 : index
    %c0_4 = arith.constant 0 : index
    %8 = vector.load %arg8[%c0, %c0_4] : memref<8x128xf32, #tpu.memory_space<vmem>>, vector<8x128xf32>
    %c0_5 = arith.constant 0 : index
    %c0_6 = arith.constant 0 : index
    %c0_7 = arith.constant 0 : index
    %9 = vector.load %arg4[%c0_5, %c0_6, %c0_7] : memref<1x8x128xbf16, #tpu.memory_space<vmem>>, vector<1x8x128xbf16>
    %10 = vector.shape_cast %9 : vector<1x8x128xbf16> to vector<8x128xbf16>
    %c0_8 = arith.constant 0 : index
    %c0_9 = arith.constant 0 : index
    %c0_10 = arith.constant 0 : index
    %11 = vector.load %arg5[%c0_8, %c0_9, %c0_10] : memref<1x128x128xbf16, #tpu.memory_space<vmem>>, vector<1x128x128xbf16>
    %12 = vector.shape_cast %11 : vector<1x128x128xbf16> to vector<128x128xbf16>
    %cst = arith.constant dense<0.000000e+00> : vector<8x128xf32>
    %13 = tpu.matmul %10, %12, %cst {dimension_numbers = #tpu.dot_dimension_numbers<[1], [0], [0], [1], [0, 0, 1, 1], [], []>} : vector<8x128xbf16>, vector<128x128xbf16>, vector<8x128xf32> -> vector<8x128xf32>
    %14 = arith.addf %8, %13 : vector<8x128xf32>
    %c0_11 = arith.constant 0 : index
    %c0_12 = arith.constant 0 : index
    %15 = vector.load %arg8[%c0_11, %c0_12] : memref<8x128xf32, #tpu.memory_space<vmem>>, vector<8x128xf32>
    tpu.vector_store %arg8[%c0_11, %c0_12], %14 {strides = array<i32>} : memref<8x128xf32, #tpu.memory_space<vmem>>, vector<8x128xf32>,
    %c0_i32_13 = arith.constant 0 : i32
    %16 = arith.cmpi eq, %arg3, %c0_i32_13 : i32
    %17 = arith.extui %16 : i1 to i32
    %c0_i32_14 = arith.constant 0 : i32
    %18 = arith.cmpi ne, %17, %c0_i32_14 : i32
    scf.if %18 {
      %c0_15 = arith.constant 0 : index
      %c0_16 = arith.constant 0 : index
      %19 = vector.load %arg8[%c0_15, %c0_16] : memref<8x128xf32, #tpu.memory_space<vmem>>, vector<8x128xf32>
      %20 = arith.truncf %19 : vector<8x128xf32> to vector<8x128xbf16>
      %c0_17 = arith.constant 0 : index
      %c0_18 = arith.constant 0 : index
      %c0_19 = arith.constant 0 : index
      %21 = vector.load %arg6[%c0_17, %c0_18, %c0_19] : memref<1x8x128xbf16, #tpu.memory_space<vmem>>, vector<1x8x128xbf16>
      %22 = vector.shape_cast %21 : vector<1x8x128xbf16> to vector<8x128xbf16>
      %23 = vector.shape_cast %20 : vector<8x128xbf16> to vector<1x8x128xbf16>
      tpu.vector_store %arg6[%c0_17, %c0_18, %c0_19], %23 {strides = array<i32>} : memref<1x8x128xbf16, #tpu.memory_space<vmem>>, vector<1x8x128xbf16>,
      %c0_20 = arith.constant 0 : index
      %c0_21 = arith.constant 0 : index
      %c0_22 = arith.constant 0 : index
      %24 = vector.load %arg7[%c0_20, %c0_21, %c0_22] : memref<1x8x128xf32, #tpu.memory_space<vmem>>, vector<1x1x128xf32>
      %25 = vector.shape_cast %24 : vector<1x1x128xf32> to vector<1x128xf32>
      %cst_23 = arith.constant dense<0.000000e+00> : vector<128xf32>
      %26 = vector.multi_reduction <add>, %19, %cst_23 [0] : vector<8x128xf32> to vector<128xf32>
      %27 = vector.shape_cast %26 : vector<128xf32> to vector<1x128xf32>
      %28 = arith.addf %25, %27 : vector<1x128xf32>
      %c0_24 = arith.constant 0 : index
      %c0_25 = arith.constant 0 : index
      %c0_26 = arith.constant 0 : index
      %29 = vector.load %arg7[%c0_24, %c0_25, %c0_26] : memref<1x8x128xf32, #tpu.memory_space<vmem>>, vector<1x1x128xf32>
      %30 = vector.shape_cast %29 : vector<1x1x128xf32> to vector<1x128xf32>
      %31 = vector.shape_cast %28 : vector<1x128xf32> to vector<1x1x128xf32>
      tpu.vector_store %arg7[%c0_24, %c0_25, %c0_26], %31 {strides = array<i32>} : memref<1x8x128xf32, #tpu.memory_space<vmem>>, vector<1x1x128xf32>,
      %c0_27 = arith.constant 0 : index
      %c1 = arith.constant 1 : index
      %c0_28 = arith.constant 0 : index
      %32 = vector.load %arg7[%c0_27, %c1, %c0_28] : memref<1x8x128xf32, #tpu.memory_space<vmem>>, vector<1x1x128xf32>
      %33 = vector.shape_cast %32 : vector<1x1x128xf32> to vector<1x128xf32>
      %34 = arith.mulf %19, %19 : vector<8x128xf32>
      %cst_29 = arith.constant dense<0.000000e+00> : vector<128xf32>
      %35 = vector.multi_reduction <add>, %34, %cst_29 [0] : vector<8x128xf32> to vector<128xf32>
      %36 = vector.shape_cast %35 : vector<128xf32> to vector<1x128xf32>
      %37 = arith.addf %33, %36 : vector<1x128xf32>
      %c0_30 = arith.constant 0 : index
      %c1_31 = arith.constant 1 : index
      %c0_32 = arith.constant 0 : index
      %38 = vector.load %arg7[%c0_30, %c1_31, %c0_32] : memref<1x8x128xf32, #tpu.memory_space<vmem>>, vector<1x1x128xf32>
      %39 = vector.shape_cast %38 : vector<1x1x128xf32> to vector<1x128xf32>
      %40 = vector.shape_cast %37 : vector<1x128xf32> to vector<1x1x128xf32>
      tpu.vector_store %arg7[%c0_30, %c1_31, %c0_32], %40 {strides = array<i32>} : memref<1x8x128xf32, #tpu.memory_space<vmem>>, vector<1x1x128xf32>,
    } else {
    }
    return
  }
  func.func @transform_0(%arg0: i32, %arg1: i32, %arg2: i32, %arg3: i32) -> (i32, i32, i32) {
    %c0_i32 = arith.constant 0 : i32
    return %arg1, %arg2, %arg3 : i32, i32, i32
  }
  func.func @transform_1(%arg0: i32, %arg1: i32, %arg2: i32, %arg3: i32) -> (i32, i32, i32) {
    %c0_i32 = arith.constant 0 : i32
    return %arg1, %arg3, %arg0 : i32, i32, i32
  }
  func.func @transform_2(%arg0: i32, %arg1: i32, %arg2: i32, %arg3: i32) -> (i32, i32, i32) {
    %c0_i32 = arith.constant 0 : i32
    return %arg1, %arg2, %arg0 : i32, i32, i32
  }
  func.func @transform_3(%arg0: i32, %arg1: i32, %arg2: i32, %arg3: i32) -> (i32, i32, i32) {
    %c0_i32 = arith.constant 0 : i32
    %c0_i32_0 = arith.constant 0 : i32
    return %arg1, %c0_i32, %arg0 : i32, i32, i32
  }
}

module attributes {stable_mosaic.version = 11 : i64} {
  func.func @_mm_stats_kernel(%arg0: i32, %arg1: i32, %arg2: i32, %arg3: i32, %arg4: memref<1x32x128xbf16, #tpu.memory_space<vmem>>, %arg5: memref<1x128x128xbf16, #tpu.memory_space<vmem>>, %arg6: memref<1x32x128xbf16, #tpu.memory_space<vmem>>, %arg7: memref<1x8x128xf32, #tpu.memory_space<vmem>>, %arg8: memref<32x128xf32, #tpu.memory_space<vmem>>) attributes {dimension_semantics = [#tpu.dimension_semantics<parallel>, #tpu.dimension_semantics<parallel>, #tpu.dimension_semantics<arbitrary>, #tpu.dimension_semantics<arbitrary>], iteration_bounds = array<i64: 1, 4, 1, 1>, scalar_prefetch = 0 : i64, scratch_operands = 1 : i64, tpu.core_type = #tpu.core_type<tc>, window_params = [{transform_indices = @transform_0, window_bounds = array<i64: 1, 32, 128>}, {transform_indices = @transform_1, window_bounds = array<i64: 1, 128, 128>}, {transform_indices = @transform_2, window_bounds = array<i64: 1, 32, 128>}, {transform_indices = @transform_3, window_bounds = array<i64: 1, 8, 128>}]} {
    %c0_i32 = arith.constant 0 : i32
    %0 = arith.cmpi eq, %arg3, %c0_i32 : i32
    %1 = arith.extui %0 : i1 to i32
    %c0_i32_0 = arith.constant 0 : i32
    %2 = arith.cmpi ne, %1, %c0_i32_0 : i32
    scf.if %2 {
      %cst_15 = arith.constant 0.000000e+00 : f32
      %19 = vector.broadcast %cst_15 : f32 to vector<32x128xf32>
      %c0_16 = arith.constant 0 : index
      %c0_17 = arith.constant 0 : index
      %20 = vector.load %arg8[%c0_16, %c0_17] : memref<32x128xf32, #tpu.memory_space<vmem>>, vector<32x128xf32>
      tpu.vector_store %arg8[%c0_16, %c0_17], %19 {strides = array<i32>} : memref<32x128xf32, #tpu.memory_space<vmem>>, vector<32x128xf32>,
    } else {
    }
    %c0_i32_1 = arith.constant 0 : i32
    %3 = arith.cmpi eq, %arg2, %c0_i32_1 : i32
    %c0_i32_2 = arith.constant 0 : i32
    %4 = arith.cmpi eq, %arg3, %c0_i32_2 : i32
    %5 = arith.andi %3, %4 : i1
    %6 = arith.extui %5 : i1 to i32
    %c0_i32_3 = arith.constant 0 : i32
    %7 = arith.cmpi ne, %6, %c0_i32_3 : i32
    scf.if %7 {
      %cst_15 = arith.constant 0.000000e+00 : f32
      %19 = vector.broadcast %cst_15 : f32 to vector<8x128xf32>
      %c0_16 = arith.constant 0 : index
      %c0_17 = arith.constant 0 : index
      %c0_18 = arith.constant 0 : index
      %20 = vector.load %arg7[%c0_16, %c0_17, %c0_18] : memref<1x8x128xf32, #tpu.memory_space<vmem>>, vector<1x8x128xf32>
      %21 = vector.shape_cast %20 : vector<1x8x128xf32> to vector<8x128xf32>
      %22 = vector.shape_cast %19 : vector<8x128xf32> to vector<1x8x128xf32>
      tpu.vector_store %arg7[%c0_16, %c0_17, %c0_18], %22 {strides = array<i32>} : memref<1x8x128xf32, #tpu.memory_space<vmem>>, vector<1x8x128xf32>,
    } else {
    }
    %c0 = arith.constant 0 : index
    %c0_4 = arith.constant 0 : index
    %8 = vector.load %arg8[%c0, %c0_4] : memref<32x128xf32, #tpu.memory_space<vmem>>, vector<32x128xf32>
    %c0_5 = arith.constant 0 : index
    %c0_6 = arith.constant 0 : index
    %c0_7 = arith.constant 0 : index
    %9 = vector.load %arg4[%c0_5, %c0_6, %c0_7] : memref<1x32x128xbf16, #tpu.memory_space<vmem>>, vector<1x32x128xbf16>
    %10 = vector.shape_cast %9 : vector<1x32x128xbf16> to vector<32x128xbf16>
    %c0_8 = arith.constant 0 : index
    %c0_9 = arith.constant 0 : index
    %c0_10 = arith.constant 0 : index
    %11 = vector.load %arg5[%c0_8, %c0_9, %c0_10] : memref<1x128x128xbf16, #tpu.memory_space<vmem>>, vector<1x128x128xbf16>
    %12 = vector.shape_cast %11 : vector<1x128x128xbf16> to vector<128x128xbf16>
    %cst = arith.constant dense<0.000000e+00> : vector<32x128xf32>
    %13 = tpu.matmul %10, %12, %cst {dimension_numbers = #tpu.dot_dimension_numbers<[1], [0], [0], [1], [0, 0, 1, 1], [], []>} : vector<32x128xbf16>, vector<128x128xbf16>, vector<32x128xf32> -> vector<32x128xf32>
    %14 = arith.addf %8, %13 : vector<32x128xf32>
    %c0_11 = arith.constant 0 : index
    %c0_12 = arith.constant 0 : index
    %15 = vector.load %arg8[%c0_11, %c0_12] : memref<32x128xf32, #tpu.memory_space<vmem>>, vector<32x128xf32>
    tpu.vector_store %arg8[%c0_11, %c0_12], %14 {strides = array<i32>} : memref<32x128xf32, #tpu.memory_space<vmem>>, vector<32x128xf32>,
    %c0_i32_13 = arith.constant 0 : i32
    %16 = arith.cmpi eq, %arg3, %c0_i32_13 : i32
    %17 = arith.extui %16 : i1 to i32
    %c0_i32_14 = arith.constant 0 : i32
    %18 = arith.cmpi ne, %17, %c0_i32_14 : i32
    scf.if %18 {
      %c0_15 = arith.constant 0 : index
      %c0_16 = arith.constant 0 : index
      %19 = vector.load %arg8[%c0_15, %c0_16] : memref<32x128xf32, #tpu.memory_space<vmem>>, vector<32x128xf32>
      %20 = arith.truncf %19 : vector<32x128xf32> to vector<32x128xbf16>
      %c0_17 = arith.constant 0 : index
      %c0_18 = arith.constant 0 : index
      %c0_19 = arith.constant 0 : index
      %21 = vector.load %arg6[%c0_17, %c0_18, %c0_19] : memref<1x32x128xbf16, #tpu.memory_space<vmem>>, vector<1x32x128xbf16>
      %22 = vector.shape_cast %21 : vector<1x32x128xbf16> to vector<32x128xbf16>
      %23 = vector.shape_cast %20 : vector<32x128xbf16> to vector<1x32x128xbf16>
      tpu.vector_store %arg6[%c0_17, %c0_18, %c0_19], %23 {strides = array<i32>} : memref<1x32x128xbf16, #tpu.memory_space<vmem>>, vector<1x32x128xbf16>,
      %c0_20 = arith.constant 0 : index
      %c0_21 = arith.constant 0 : index
      %c0_22 = arith.constant 0 : index
      %24 = vector.load %arg7[%c0_20, %c0_21, %c0_22] : memref<1x8x128xf32, #tpu.memory_space<vmem>>, vector<1x1x128xf32>
      %25 = vector.shape_cast %24 : vector<1x1x128xf32> to vector<1x128xf32>
      %cst_23 = arith.constant dense<0.000000e+00> : vector<128xf32>
      %26 = vector.multi_reduction <add>, %19, %cst_23 [0] : vector<32x128xf32> to vector<128xf32>
      %27 = vector.shape_cast %26 : vector<128xf32> to vector<1x128xf32>
      %28 = arith.addf %25, %27 : vector<1x128xf32>
      %c0_24 = arith.constant 0 : index
      %c0_25 = arith.constant 0 : index
      %c0_26 = arith.constant 0 : index
      %29 = vector.load %arg7[%c0_24, %c0_25, %c0_26] : memref<1x8x128xf32, #tpu.memory_space<vmem>>, vector<1x1x128xf32>
      %30 = vector.shape_cast %29 : vector<1x1x128xf32> to vector<1x128xf32>
      %31 = vector.shape_cast %28 : vector<1x128xf32> to vector<1x1x128xf32>
      tpu.vector_store %arg7[%c0_24, %c0_25, %c0_26], %31 {strides = array<i32>} : memref<1x8x128xf32, #tpu.memory_space<vmem>>, vector<1x1x128xf32>,
      %c0_27 = arith.constant 0 : index
      %c1 = arith.constant 1 : index
      %c0_28 = arith.constant 0 : index
      %32 = vector.load %arg7[%c0_27, %c1, %c0_28] : memref<1x8x128xf32, #tpu.memory_space<vmem>>, vector<1x1x128xf32>
      %33 = vector.shape_cast %32 : vector<1x1x128xf32> to vector<1x128xf32>
      %34 = arith.mulf %19, %19 : vector<32x128xf32>
      %cst_29 = arith.constant dense<0.000000e+00> : vector<128xf32>
      %35 = vector.multi_reduction <add>, %34, %cst_29 [0] : vector<32x128xf32> to vector<128xf32>
      %36 = vector.shape_cast %35 : vector<128xf32> to vector<1x128xf32>
      %37 = arith.addf %33, %36 : vector<1x128xf32>
      %c0_30 = arith.constant 0 : index
      %c1_31 = arith.constant 1 : index
      %c0_32 = arith.constant 0 : index
      %38 = vector.load %arg7[%c0_30, %c1_31, %c0_32] : memref<1x8x128xf32, #tpu.memory_space<vmem>>, vector<1x1x128xf32>
      %39 = vector.shape_cast %38 : vector<1x1x128xf32> to vector<1x128xf32>
      %40 = vector.shape_cast %37 : vector<1x128xf32> to vector<1x1x128xf32>
      tpu.vector_store %arg7[%c0_30, %c1_31, %c0_32], %40 {strides = array<i32>} : memref<1x8x128xf32, #tpu.memory_space<vmem>>, vector<1x1x128xf32>,
    } else {
    }
    return
  }
  func.func @transform_0(%arg0: i32, %arg1: i32, %arg2: i32, %arg3: i32) -> (i32, i32, i32) {
    %c0_i32 = arith.constant 0 : i32
    return %arg1, %arg2, %arg3 : i32, i32, i32
  }
  func.func @transform_1(%arg0: i32, %arg1: i32, %arg2: i32, %arg3: i32) -> (i32, i32, i32) {
    %c0_i32 = arith.constant 0 : i32
    return %arg1, %arg3, %arg0 : i32, i32, i32
  }
  func.func @transform_2(%arg0: i32, %arg1: i32, %arg2: i32, %arg3: i32) -> (i32, i32, i32) {
    %c0_i32 = arith.constant 0 : i32
    return %arg1, %arg2, %arg0 : i32, i32, i32
  }
  func.func @transform_3(%arg0: i32, %arg1: i32, %arg2: i32, %arg3: i32) -> (i32, i32, i32) {
    %c0_i32 = arith.constant 0 : i32
    %c0_i32_0 = arith.constant 0 : i32
    return %arg1, %c0_i32, %arg0 : i32, i32, i32
  }
}

module attributes {stable_mosaic.version = 11 : i64} {
  func.func @_mm_stats_kernel(%arg0: i32, %arg1: i32, %arg2: i32, %arg3: i32, %arg4: memref<1x128x128xbf16, #tpu.memory_space<vmem>>, %arg5: memref<1x128x128xbf16, #tpu.memory_space<vmem>>, %arg6: memref<1x128x128xf32, #tpu.memory_space<vmem>>, %arg7: memref<1x8x128xf32, #tpu.memory_space<vmem>>, %arg8: memref<128x128xf32, #tpu.memory_space<vmem>>) attributes {dimension_semantics = [#tpu.dimension_semantics<parallel>, #tpu.dimension_semantics<parallel>, #tpu.dimension_semantics<arbitrary>, #tpu.dimension_semantics<arbitrary>], iteration_bounds = array<i64: 1, 4, 1, 1>, scalar_prefetch = 0 : i64, scratch_operands = 1 : i64, tpu.core_type = #tpu.core_type<tc>, window_params = [{transform_indices = @transform_0, window_bounds = array<i64: 1, 128, 128>}, {transform_indices = @transform_1, window_bounds = array<i64: 1, 128, 128>}, {transform_indices = @transform_2, window_bounds = array<i64: 1, 128, 128>}, {transform_indices = @transform_3, window_bounds = array<i64: 1, 8, 128>}]} {
    %c0_i32 = arith.constant 0 : i32
    %0 = arith.cmpi eq, %arg3, %c0_i32 : i32
    %1 = arith.extui %0 : i1 to i32
    %c0_i32_0 = arith.constant 0 : i32
    %2 = arith.cmpi ne, %1, %c0_i32_0 : i32
    scf.if %2 {
      %cst_15 = arith.constant 0.000000e+00 : f32
      %19 = vector.broadcast %cst_15 : f32 to vector<128x128xf32>
      %c0_16 = arith.constant 0 : index
      %c0_17 = arith.constant 0 : index
      %20 = vector.load %arg8[%c0_16, %c0_17] : memref<128x128xf32, #tpu.memory_space<vmem>>, vector<128x128xf32>
      tpu.vector_store %arg8[%c0_16, %c0_17], %19 {strides = array<i32>} : memref<128x128xf32, #tpu.memory_space<vmem>>, vector<128x128xf32>,
    } else {
    }
    %c0_i32_1 = arith.constant 0 : i32
    %3 = arith.cmpi eq, %arg2, %c0_i32_1 : i32
    %c0_i32_2 = arith.constant 0 : i32
    %4 = arith.cmpi eq, %arg3, %c0_i32_2 : i32
    %5 = arith.andi %3, %4 : i1
    %6 = arith.extui %5 : i1 to i32
    %c0_i32_3 = arith.constant 0 : i32
    %7 = arith.cmpi ne, %6, %c0_i32_3 : i32
    scf.if %7 {
      %cst_15 = arith.constant 0.000000e+00 : f32
      %19 = vector.broadcast %cst_15 : f32 to vector<8x128xf32>
      %c0_16 = arith.constant 0 : index
      %c0_17 = arith.constant 0 : index
      %c0_18 = arith.constant 0 : index
      %20 = vector.load %arg7[%c0_16, %c0_17, %c0_18] : memref<1x8x128xf32, #tpu.memory_space<vmem>>, vector<1x8x128xf32>
      %21 = vector.shape_cast %20 : vector<1x8x128xf32> to vector<8x128xf32>
      %22 = vector.shape_cast %19 : vector<8x128xf32> to vector<1x8x128xf32>
      tpu.vector_store %arg7[%c0_16, %c0_17, %c0_18], %22 {strides = array<i32>} : memref<1x8x128xf32, #tpu.memory_space<vmem>>, vector<1x8x128xf32>,
    } else {
    }
    %c0 = arith.constant 0 : index
    %c0_4 = arith.constant 0 : index
    %8 = vector.load %arg8[%c0, %c0_4] : memref<128x128xf32, #tpu.memory_space<vmem>>, vector<128x128xf32>
    %c0_5 = arith.constant 0 : index
    %c0_6 = arith.constant 0 : index
    %c0_7 = arith.constant 0 : index
    %9 = vector.load %arg4[%c0_5, %c0_6, %c0_7] : memref<1x128x128xbf16, #tpu.memory_space<vmem>>, vector<1x128x128xbf16>
    %10 = vector.shape_cast %9 : vector<1x128x128xbf16> to vector<128x128xbf16>
    %c0_8 = arith.constant 0 : index
    %c0_9 = arith.constant 0 : index
    %c0_10 = arith.constant 0 : index
    %11 = vector.load %arg5[%c0_8, %c0_9, %c0_10] : memref<1x128x128xbf16, #tpu.memory_space<vmem>>, vector<1x128x128xbf16>
    %12 = vector.shape_cast %11 : vector<1x128x128xbf16> to vector<128x128xbf16>
    %cst = arith.constant dense<0.000000e+00> : vector<128x128xf32>
    %13 = tpu.matmul %10, %12, %cst {dimension_numbers = #tpu.dot_dimension_numbers<[1], [0], [0], [1], [0, 0, 1, 1], [], []>} : vector<128x128xbf16>, vector<128x128xbf16>, vector<128x128xf32> -> vector<128x128xf32>
    %14 = arith.addf %8, %13 : vector<128x128xf32>
    %c0_11 = arith.constant 0 : index
    %c0_12 = arith.constant 0 : index
    %15 = vector.load %arg8[%c0_11, %c0_12] : memref<128x128xf32, #tpu.memory_space<vmem>>, vector<128x128xf32>
    tpu.vector_store %arg8[%c0_11, %c0_12], %14 {strides = array<i32>} : memref<128x128xf32, #tpu.memory_space<vmem>>, vector<128x128xf32>,
    %c0_i32_13 = arith.constant 0 : i32
    %16 = arith.cmpi eq, %arg3, %c0_i32_13 : i32
    %17 = arith.extui %16 : i1 to i32
    %c0_i32_14 = arith.constant 0 : i32
    %18 = arith.cmpi ne, %17, %c0_i32_14 : i32
    scf.if %18 {
      %c0_15 = arith.constant 0 : index
      %c0_16 = arith.constant 0 : index
      %19 = vector.load %arg8[%c0_15, %c0_16] : memref<128x128xf32, #tpu.memory_space<vmem>>, vector<128x128xf32>
      %20 = math.tanh %19 : vector<128x128xf32>
      %c0_17 = arith.constant 0 : index
      %c0_18 = arith.constant 0 : index
      %c0_19 = arith.constant 0 : index
      %21 = vector.load %arg6[%c0_17, %c0_18, %c0_19] : memref<1x128x128xf32, #tpu.memory_space<vmem>>, vector<1x128x128xf32>
      %22 = vector.shape_cast %21 : vector<1x128x128xf32> to vector<128x128xf32>
      %23 = vector.shape_cast %20 : vector<128x128xf32> to vector<1x128x128xf32>
      tpu.vector_store %arg6[%c0_17, %c0_18, %c0_19], %23 {strides = array<i32>} : memref<1x128x128xf32, #tpu.memory_space<vmem>>, vector<1x128x128xf32>,
      %c0_20 = arith.constant 0 : index
      %c0_21 = arith.constant 0 : index
      %c0_22 = arith.constant 0 : index
      %24 = vector.load %arg7[%c0_20, %c0_21, %c0_22] : memref<1x8x128xf32, #tpu.memory_space<vmem>>, vector<1x1x128xf32>
      %25 = vector.shape_cast %24 : vector<1x1x128xf32> to vector<1x128xf32>
      %cst_23 = arith.constant dense<0.000000e+00> : vector<128xf32>
      %26 = vector.multi_reduction <add>, %20, %cst_23 [0] : vector<128x128xf32> to vector<128xf32>
      %27 = vector.shape_cast %26 : vector<128xf32> to vector<1x128xf32>
      %28 = arith.addf %25, %27 : vector<1x128xf32>
      %c0_24 = arith.constant 0 : index
      %c0_25 = arith.constant 0 : index
      %c0_26 = arith.constant 0 : index
      %29 = vector.load %arg7[%c0_24, %c0_25, %c0_26] : memref<1x8x128xf32, #tpu.memory_space<vmem>>, vector<1x1x128xf32>
      %30 = vector.shape_cast %29 : vector<1x1x128xf32> to vector<1x128xf32>
      %31 = vector.shape_cast %28 : vector<1x128xf32> to vector<1x1x128xf32>
      tpu.vector_store %arg7[%c0_24, %c0_25, %c0_26], %31 {strides = array<i32>} : memref<1x8x128xf32, #tpu.memory_space<vmem>>, vector<1x1x128xf32>,
      %c0_27 = arith.constant 0 : index
      %c1 = arith.constant 1 : index
      %c0_28 = arith.constant 0 : index
      %32 = vector.load %arg7[%c0_27, %c1, %c0_28] : memref<1x8x128xf32, #tpu.memory_space<vmem>>, vector<1x1x128xf32>
      %33 = vector.shape_cast %32 : vector<1x1x128xf32> to vector<1x128xf32>
      %34 = arith.mulf %20, %20 : vector<128x128xf32>
      %cst_29 = arith.constant dense<0.000000e+00> : vector<128xf32>
      %35 = vector.multi_reduction <add>, %34, %cst_29 [0] : vector<128x128xf32> to vector<128xf32>
      %36 = vector.shape_cast %35 : vector<128xf32> to vector<1x128xf32>
      %37 = arith.addf %33, %36 : vector<1x128xf32>
      %c0_30 = arith.constant 0 : index
      %c1_31 = arith.constant 1 : index
      %c0_32 = arith.constant 0 : index
      %38 = vector.load %arg7[%c0_30, %c1_31, %c0_32] : memref<1x8x128xf32, #tpu.memory_space<vmem>>, vector<1x1x128xf32>
      %39 = vector.shape_cast %38 : vector<1x1x128xf32> to vector<1x128xf32>
      %40 = vector.shape_cast %37 : vector<1x128xf32> to vector<1x1x128xf32>
      tpu.vector_store %arg7[%c0_30, %c1_31, %c0_32], %40 {strides = array<i32>} : memref<1x8x128xf32, #tpu.memory_space<vmem>>, vector<1x1x128xf32>,
    } else {
    }
    return
  }
  func.func @transform_0(%arg0: i32, %arg1: i32, %arg2: i32, %arg3: i32) -> (i32, i32, i32) {
    %c0_i32 = arith.constant 0 : i32
    return %arg1, %arg2, %arg3 : i32, i32, i32
  }
  func.func @transform_1(%arg0: i32, %arg1: i32, %arg2: i32, %arg3: i32) -> (i32, i32, i32) {
    %c0_i32 = arith.constant 0 : i32
    return %arg1, %arg3, %arg0 : i32, i32, i32
  }
  func.func @transform_2(%arg0: i32, %arg1: i32, %arg2: i32, %arg3: i32) -> (i32, i32, i32) {
    %c0_i32 = arith.constant 0 : i32
    return %arg1, %arg2, %arg0 : i32, i32, i32
  }
  func.func @transform_3(%arg0: i32, %arg1: i32, %arg2: i32, %arg3: i32) -> (i32, i32, i32) {
    %c0_i32 = arith.constant 0 : i32
    %c0_i32_0 = arith.constant 0 : i32
    return %arg1, %c0_i32, %arg0 : i32, i32, i32
  }
}

</mosaic_0001>

<bundles_post_ra>
// kernel: _lambda_.5
= control target key start
LH: loop header
LB: loop body
LE: loop exit
PB: predicated region body
PF: predicated region fallthrough
CT: control target
= control target key end

     0   :  { %9 = vsyncpa [#allocation4], 0  ;;  %s981_s0 = inlined_call_operand.vmem [shape: bf16[16,8,128], index: 0, kind: input, shape index: {}]   ;;  %s982_s1 = inlined_call_operand.hbm [shape: bf16[16,128,128], index: 1, kind: input, shape index: {}]   ;;  %s983_s2 = inlined_call_operand.vmem [shape: bf16[16,8,128], index: 2, kind: output, shape index: {0}]   ;;  %s984_s3 = inlined_call_operand.vmem [shape: f32[16,8,128], index: 3, kind: output, shape index: {1}]  }
   0x1   :  { %11 = vsyncpa [#allocation4 + $0x1], 0  ;;  %s830_s12 = smov 0   ;;  %s832_s13 = smov 0  }
   0x2   :  { %s834_s14 = smov 0   ;;  %s836_s15 = smov 0  }
   0x3   :  { %s838_s16 = smov 0   ;;  %s840_s17 = smov 0  }
   0x4 LB: > { %s604_s18 = sadd.s32 4294967295, %s803_s17   ;;  %s39_s19 = sadd.s32 1, %s799_s16  ;;  %s803_s17 = sphi %s840_s17, %s17_s17   ;;  %s799_s16 = sphi %s838_s16, %s992_s16   ;;  %s795_s15 = sphi %s836_s15, %s991_s15   ;;  %s791_s14 = sphi %s834_s14, %s990_s14   ;;  %s787_s13 = sphi %s832_s13, %s989_s13   ;;  %s783_s12 = sphi %s830_s12, %s988_s12  }
   0x5   : > { %p41_p0 = scmp.ge.s32.totalorder %s39_s19, 16  ;;  %s84_s20 = sadd.s32 1, %s791_s14 }
   0x6   : > { %p91_p1 = scmp.ne.s32.totalorder %s791_s14, %s787_s13  ;;  %p92_p2 = scmp.eq.s32.totalorder %s803_s17, 0 }
   0x7   : > { %s994_s19 = smov (%p41_p0, %s39_s19), 0  ;;  %p97_p4 = scmp.ne.s32.totalorder %s787_s13, %s783_s12 }
   0x8   : > { %p866_p3 = por %p92_p2, %p91_p1  ;;  %s77_s22 = ssub.s32 %s799_s16, %s994_s19 }
   0x9   : > { %p98_p5 = scmp.eq.s32.totalorder %s604_s18, 0  ;;  %p82_p6 = scmp.eq.s32.totalorder %s77_s22, 0 }
   0xa   : > { %p662_p8 = scmp.lt.s32.totalorder %s803_s17, 16  ;;  %s192_s25 = sand.u32 1, %s791_s14  }
   0xb   : > { %p873_p7 = por %p98_p5, %p97_p4  ;;  %s626_s26 = sshll.u32 %s799_s16, 10 }
   0xc   : > { %s879_s24 = scalar_select %p82_p6, %s791_s14, %s84_s20  }
   0xd   : > { %s608_s27 = sshll.u32 %s192_s25, 6  ;;  %s886_s30 = scalar_lea.hbm %s982_s1, %s626_s26 }
   0xe   : > { %s196_s4 = scalar_lea.vmem [#allocation3], %s608_s27  ;;  %p890_p9 = pnand %p662_p8, %p866_p3 }
   0xf   : > { %s206_s5 = sshll.u32 %s196_s4, 4  ;;  %s896_s7 = scalar_lea.sflag [#allocation4], %s192_s25  ;;  %s894_s5 = int_to_ptr.vmem [resolvable:$true] %s206_s5 }
  0x10   : > { %s723_s8 = scalar_lea.hbm %s886_s30, 1024  ;;  %p725_p11 = pneg %p890_p9 }
  0x11   : > { %p724_p10 = scmp.ne.s32.totalorder %s886_s30, %s723_s8  ;;  %s728_s11 = scalar_lea.hbm %s982_s1, 16384 }
  0x12   : > { %p729_p0 = scmp.lt.u32.totalorder %s886_s30, %s982_s1  ;;  %p730_p1 = scmp.lt.u32.totalorder %s728_s11, %s723_s8 }
  0x13   : > { %p726_p12 = pnand %p725_p11, %p724_p10  ;;  %p732_p3 = scmp.lt.u32.totalorder %s723_s8, %s886_s30 }
  0x14   : > { %p731_p2 = por %p730_p1, %p729_p0 }
  0x15   : > { %p727_p13 = pneg %p726_p12 }
  0x16   : > { %p733_p4 = por %p732_p3, %p731_p2 }
  0x18   : > { %p734_p5 = pnand %p733_p4, %p727_p13 }
  0x1a   : > { %737 = shalt.err (!%p734_p5)
}
  0x1b   : > { %s738_s20 = scalar_lea.vmem %s894_s5, 1024  ;;  %s805_s21 = smov [#allocation3]  }
  0x1c   : > { %p739_p6 = scmp.ne.s32.totalorder %s894_s5, %s738_s20  ;;  %s743_s22 = sshll.u32 %s805_s21, 4  ;;  %s744_s22 = int_to_ptr.vmem [resolvable:$false] %s743_s22 }
  0x1d   : > { %s745_s25 = scalar_lea.vmem %s744_s22, 2048  ;;  %p746_p12 = scmp.lt.s32.totalorder %s894_s5, %s744_s22 }
  0x1e   : > { %p741_p8 = pnand %p739_p6, %p725_p11  ;;  %p747_p0 = scmp.lt.s32.totalorder %s745_s25, %s738_s20 }
  0x20   : > { %p742_p10 = pneg %p741_p8  ;;  %p748_p1 = por %p747_p0, %p746_p12 }
  0x22   : > { %p749_p2 = pnand %p748_p1, %p742_p10 }
  0x24   : > { %752 = shalt.err (!%p749_p2)
}
  0x25   : > { %s806_s26 = smov 64   ;;  %s807_s27 = smov 4  }
  0x26   : > { %661 = dma.hbm_to_vmem [thread:$0]  (!%p890_p9), %s886_s30, 1024, %s894_s5, %s896_s7, %s806_s26, %s806_s26, %s807_s27  }
  0x27   : > { %p611_p11 = scmp.ge.s32.totalorder %s803_s17, 1  ;;  %p214_p13 = scmp.lt.s32.totalorder %s803_s17, 17 }
  0x29   : > { %p215_p3 = pnand %p611_p11, %p214_p13 }
  0x2a   : > { %s220_s28 = sand.u32 (!%p215_p3), 1, %s787_s13  }
  0x2b   : > { %218 = sbr.rel (%p215_p3) target bundleno = 313 (0x139), region = 28  ;;  %s612_s29 = sshll.u32 (!%p215_p3), %s220_s28, 6 }
  0x2c   : > { %s221_s4 = scalar_lea.sflag (!%p215_p3), [#allocation4], %s220_s28  ;;  %s927_s8 = scalar_lea.vmem (!%p215_p3), [#allocation3], %s612_s29 }
  0x32   : > { %778 = dma.done.wait (%p873_p7), %s221_s4, 1024  }
  0x33   : > { %780 = vsyncadd (%p873_p7), %s221_s4, 4294966272  ;;  %p269_p9 = scmp.lt.s32.totalorder %s795_s15, 15  ;;  %v808_v0 = vmov 0.0   ;;  %vm809_vm0 = vmmov 0   ;;  %v715_v1 = vld [vmem:[%s927_s8] sm:$0xff]   ;;  %v716_v2 = vld [vmem:[%s927_s8 + $0x8] sm:$0xff]  }
  0x34   : > { %636 = vmatprep.subr.bf16.mxu0 %v808_v0  ;;  %652 = vmatprep.mubr.msk.bf16.mxu0 %vm809_vm0, %v808_v0  ;;  %v717_v3 = vld [vmem:[%s927_s8 + $0x10] sm:$0xff]   ;;  %v718_v4 = vld [vmem:[%s927_s8 + $0x18] sm:$0xff]   ;;  %v719_v5 = vld [vmem:[%s927_s8 + $0x20] sm:$0xff]  }
  0x35   : > { %s996_s15 = smov (!%p269_p9, %s795_s15), 15  ;;  %637 = vmatpush3.bf16.msra.mxu0 %v715_v1  ;;  %v720_v6 = vld [vmem:[%s927_s8 + $0x28] sm:$0xff]   ;;  %v721_v7 = vld [vmem:[%s927_s8 + $0x30] sm:$0xff]   ;;  %v722_v8 = vld [vmem:[%s927_s8 + $0x38] sm:$0xff]  }
  0x36   : > { %s615_s30 = sshll.u32 %s996_s15, 3  ;;  %638 = vmatprep.subr.bf16.mxu0 %v808_v0  ;;  %s613_s7 = sshll.u32 %s996_s15, 2 }
  0x37   : > { %s941_s23 = scalar_lea.vmem %s984_s3, %s615_s30  ;;  %s278_s11 = scalar_lea.vmem %s981_s0, %s613_s7 }
  0x38   : > { %308 = vst [vmem:[%s941_s23] sm:$0xff] %v808_v0  ;;  %v310_v9 = vld [vmem:[%s278_s11] sm:$0xf]  ;;  %s289_s20 = scalar_lea.vmem %s983_s2, %s613_s7 }
  0x39   : > { %639 = vmatpush3.bf16.msra.mxu0 %v716_v2 }
  0x3a   : > { %640 = vmatprep.subr.bf16.mxu0 %v808_v0 }
  0x3d   : > { %641 = vmatpush3.bf16.msra.mxu0 %v717_v3 }
  0x3e   : > { %642 = vmatprep.subr.bf16.mxu0 %v808_v0 }
  0x3f   : > { %v423_v25 = vld [vmem:[%s941_s23] sm:$0x1]  ;;  %v432_v28 = vld [vmem:[%s941_s23 + $0x1] sm:$0x1] }
  0x41   : > { %643 = vmatpush3.bf16.msra.mxu0 %v718_v4 }
  0x42   : > { %644 = vmatprep.subr.bf16.mxu0 %v808_v0 }
  0x45   : > { %645 = vmatpush3.bf16.msra.mxu0 %v719_v5 }
  0x46   : > { %646 = vmatprep.subr.bf16.mxu0 %v808_v0 }
  0x49   : > { %647 = vmatpush3.bf16.msra.mxu0 %v720_v6 }
  0x4a   : > { %648 = vmatprep.subr.bf16.mxu0 %v808_v0 }
  0x4d   : > { %649 = vmatpush3.bf16.msra.mxu0 %v721_v7 }
  0x4e   : > { %650 = vmatprep.subr.bf16.mxu0 %v808_v0 }
  0x51   : > { %651 = vmatpush3.bf16.msra.mxu0 %v722_v8 }
  0x54   : > { %653 = vmatmul.mubr.bf16.vlgmr.msra.gmra.mrb[0].mxu0 %v310_v9 }
 0x127   : > { %v409_v10 = vpop.f32.mrb[0].mxu0 }
 0x128   : > { %v421_v11 = vpack.c.bf16 %v409_v10, %v409_v10  ;;  %v424_v12 = vrot.slane %v409_v10, 4  ;;  %v433_v13 = vmul.f32 %v409_v10, %v409_v10  ;;  %v654_v14 = vpop.f32.mrb[1].mxu0 }
 0x129   : > { %v412_v15 = vpop.f32.mrb[2].mxu0 }
 0x12a   : > { %422 = vst [vmem:[%s289_s20] sm:$0xf] %v421_v11  ;;  %v425_v16 = vadd.f32 %v424_v12, %v409_v10  ;;  %v434_v17 = vrot.slane %v433_v13, 4  ;;  %v655_v18 = vpop.f32.mrb[3].mxu0 }
 0x12c   : > { %v426_v19 = vrot.slane %v425_v16, 2  ;;  %v435_v20 = vadd.f32 %v434_v17, %v433_v13 }
 0x12e   : > { %v427_v21 = vadd.f32 %v426_v19, %v425_v16  ;;  %v436_v22 = vrot.slane %v435_v20, 2 }
 0x130   : > { %v428_v23 = vrot.slane %v427_v21, 1  ;;  %v437_v24 = vadd.f32 %v436_v22, %v435_v20 }
 0x132   : > { %v429_v26 = vadd.f32 %v428_v23, %v427_v21  ;;  %v438_v27 = vrot.slane %v437_v24, 1 }
 0x134   : > { %v430_v29 = vadd.f32 %v429_v26, %v423_v25  ;;  %v439_v30 = vadd.f32 %v438_v27, %v437_v24 }
 0x136   : > { %431 = vst [vmem:[%s941_s23] sm:$0x1] %v430_v29  ;;  %v440_v31 = vadd.f32 %v439_v30, %v432_v28 }
 0x138   : > { %441 = vst [vmem:[%s941_s23 + $0x1] sm:$0x1] %v440_v31 }
 0x139 PF: > { %s17_s17 = sadd.s32 1, %s803_s17   ;;  %s988_s12 = smov %s787_s13 }
 0x13a   : > { %p14_p7 = scmp.ge.s32.totalorder %s17_s17, 18   ;;  %s989_s13 = smov %s791_s14 }
 0x13b   : > { %s990_s14 = smov %s879_s24  ;;  %s991_s15 = smov %s799_s16 }
 0x13c   : > { %s992_s16 = smov %s994_s19  ;;  %16 = sbr.rel (!%p14_p7) target bundleno = 4 (0x4), region = 95 }
 0x143   :  { %493 = vsyncpa [#allocation4], 1 }
 0x144   :  { %495 = vsyncpa [#allocation4 + $0x1], 1 }

// kernel: _lambda_.6
= control target key start
LH: loop header
LB: loop body
LE: loop exit
PB: predicated region body
PF: predicated region fallthrough
CT: control target
= control target key end

     0   :  { %s422_s0 = inlined_call_operand.vmem [shape: bf16[128,128], index: 0, kind: input, shape index: {}]   ;;  %s423_s1 = inlined_call_operand.vmem [shape: f32[1,128], index: 1, kind: input, shape index: {}]   ;;  %s424_s2 = inlined_call_operand.vmem [shape: f32[1,128], index: 2, kind: input, shape index: {}]   ;;  %s425_s3 = inlined_call_operand.vmem [shape: bf16[128,128], index: 3, kind: output, shape index: {}]  }
   0x1   :  { %v227_v0 = vld [vmem:[%s422_s0] sm:$0xff]   ;;  %v298_v4 = vld [vmem:[%s422_s0 + $0x8] sm:$0xff]   ;;  %v299_v5 = vld [vmem:[%s422_s0 + $0x10] sm:$0xff]  }
   0x2   :  { %v338_v1 = vld [vmem:[%s423_s1] ss:$0 sm:$0xff]  ;;  %v228_v2 = vunpack.c.l.bf16 %v227_v0  ;;  %v229_v3 = vunpack.c.h.bf16 %v227_v0  ;;  %v300_v6 = vld [vmem:[%s422_s0 + $0x18] sm:$0xff]   ;;  %v232_v8 = vunpack.c.l.bf16 %v298_v4  ;;  %v233_v9 = vunpack.c.h.bf16 %v298_v4  ;;  %v302_v33 = vld [vmem:[%s422_s0 + $0x28] sm:$0xff]  }
   0x3   :  { %v352_v7 = vld [vmem:[%s424_s2] ss:$0 sm:$0xff]  ;;  %v236_v10 = vunpack.c.l.bf16 %v299_v5  ;;  %v237_v11 = vunpack.c.h.bf16 %v299_v5  ;;  %v240_v14 = vunpack.c.l.bf16 %v300_v6  ;;  %v241_v15 = vunpack.c.h.bf16 %v300_v6  ;;  %v303_v38 = vld [vmem:[%s422_s0 + $0x30] sm:$0xff]   ;;  %v304_v43 = vld [vmem:[%s422_s0 + $0x38] sm:$0xff]  }
   0x4   :  { %v53_v12 = vmul.f32 %v228_v2, %v338_v1  ;;  %v54_v13 = vmul.f32 %v229_v3, %v338_v1  ;;  %v55_v16 = vmul.f32 %v232_v8, %v338_v1  ;;  %v56_v17 = vmul.f32 %v233_v9, %v338_v1  ;;  %v301_v28 = vld [vmem:[%s422_s0 + $0x20] sm:$0xff]  }
   0x5   :  { %v57_v18 = vmul.f32 %v236_v10, %v338_v1  ;;  %v58_v19 = vmul.f32 %v237_v11, %v338_v1  ;;  %v59_v22 = vmul.f32 %v240_v14, %v338_v1  ;;  %v60_v23 = vmul.f32 %v241_v15, %v338_v1 }
   0x6   :  { %v76_v20 = vadd.f32 %v352_v7, %v53_v12  ;;  %v77_v21 = vadd.f32 %v352_v7, %v54_v13  ;;  %v78_v24 = vadd.f32 %v352_v7, %v55_v16  ;;  %v79_v25 = vadd.f32 %v352_v7, %v56_v17 }
   0x7   :  { %v80_v26 = vadd.f32 %v352_v7, %v57_v18  ;;  %v81_v27 = vadd.f32 %v352_v7, %v58_v19  ;;  %v82_v31 = vadd.f32 %v352_v7, %v59_v22  ;;  %v83_v32 = vadd.f32 %v352_v7, %v60_v23 }
   0x8   :  { %v92_v29 = vmax.f32 %v76_v20, 0.0  ;;  %v93_v30 = vmax.f32 %v77_v21, 0.0  ;;  %v94_v34 = vmax.f32 %v78_v24, 0.0  ;;  %v95_v35 = vmax.f32 %v79_v25, 0.0 }
   0x9   :  { %v96_v36 = vmax.f32 %v80_v26, 0.0  ;;  %v97_v37 = vmax.f32 %v81_v27, 0.0  ;;  %v98_v40 = vmax.f32 %v82_v31, 0.0  ;;  %v99_v41 = vmax.f32 %v83_v32, 0.0 }
   0xa   :  { %v261_v39 = vpack.c.bf16 %v93_v30, %v92_v29  ;;  %v244_v42 = vunpack.c.l.bf16 %v301_v28  ;;  %v266_v44 = vpack.c.bf16 %v95_v35, %v94_v34  ;;  %v245_v46 = vunpack.c.h.bf16 %v301_v28 }
   0xb   :  { %v271_v45 = vpack.c.bf16 %v97_v37, %v96_v36  ;;  %v248_v47 = vunpack.c.l.bf16 %v302_v33  ;;  %v276_v48 = vpack.c.bf16 %v99_v41, %v98_v40  ;;  %v249_v50 = vunpack.c.h.bf16 %v302_v33 }
   0xc   :  { %262 = vst [vmem:[%s425_s3] sm:$0xff] %v261_v39   ;;  %v61_v49 = vmul.f32 %v244_v42, %v338_v1  ;;  %v252_v51 = vunpack.c.l.bf16 %v303_v38  ;;  %305 = vst [vmem:[%s425_s3 + $0x8] sm:$0xff] %v266_v44   ;;  %v62_v52 = vmul.f32 %v245_v46, %v338_v1  ;;  %v253_v54 = vunpack.c.h.bf16 %v303_v38 }
   0xd   :  { %306 = vst [vmem:[%s425_s3 + $0x10] sm:$0xff] %v271_v45   ;;  %v63_v53 = vmul.f32 %v248_v47, %v338_v1  ;;  %v256_v55 = vunpack.c.l.bf16 %v304_v43  ;;  %307 = vst [vmem:[%s425_s3 + $0x18] sm:$0xff] %v276_v48   ;;  %v64_v57 = vmul.f32 %v249_v50, %v338_v1  ;;  %v257_v59 = vunpack.c.h.bf16 %v304_v43 }
   0xe   :  { %v84_v56 = vadd.f32 %v352_v7, %v61_v49  ;;  %v65_v58 = vmul.f32 %v252_v51, %v338_v1  ;;  %v85_v60 = vadd.f32 %v352_v7, %v62_v52  ;;  %v66_v62 = vmul.f32 %v253_v54, %v338_v1 }
   0xf   :  { %v86_v61 = vadd.f32 %v352_v7, %v63_v53  ;;  %v67_v63 = vmul.f32 %v256_v55, %v338_v1  ;;  %v87_v2 = vadd.f32 %v352_v7, %v64_v57  ;;  %v68_v4 = vmul.f32 %v257_v59, %v338_v1 }
  0x10   :  { %v100_v0 = vmax.f32 %v84_v56, 0.0  ;;  %v88_v3 = vadd.f32 %v352_v7, %v65_v58  ;;  %v101_v5 = vmax.f32 %v85_v60, 0.0  ;;  %v89_v8 = vadd.f32 %v352_v7, %v66_v62 }
  0x11   :  { %v102_v6 = vmax.f32 %v86_v61, 0.0  ;;  %v90_v9 = vadd.f32 %v352_v7, %v67_v63  ;;  %v103_v10 = vmax.f32 %v87_v2, 0.0  ;;  %v91_v12 = vadd.f32 %v352_v7, %v68_v4 }
  0x12   :  { %v104_v11 = vmax.f32 %v88_v3, 0.0  ;;  %v281_v13 = vpack.c.bf16 %v101_v5, %v100_v0  ;;  %v105_v14 = vmax.f32 %v89_v8, 0.0 }
  0x13   :  { %v106_v15 = vmax.f32 %v90_v9, 0.0  ;;  %v286_v16 = vpack.c.bf16 %v103_v10, %v102_v6  ;;  %v107_v17 = vmax.f32 %v91_v12, 0.0 }
  0x14   :  { %308 = vst [vmem:[%s425_s3 + $0x20] sm:$0xff] %v281_v13   ;;  %v291_v1 = vpack.c.bf16 %v105_v14, %v104_v11 }
  0x15   :  { %309 = vst [vmem:[%s425_s3 + $0x28] sm:$0xff] %v286_v16   ;;  %v296_v18 = vpack.c.bf16 %v107_v17, %v106_v15 }
  0x16   :  { %310 = vst [vmem:[%s425_s3 + $0x30] sm:$0xff] %v291_v1  }
  0x17   :  { %311 = vst [vmem:[%s425_s3 + $0x38] sm:$0xff] %v296_v18  }

// kernel: _lambda_.7
= control target key start
LH: loop header
LB: loop body
LE: loop exit
PB: predicated region body
PF: predicated region fallthrough
CT: control target
= control target key end

     0   :  { %s844_s12 = smov 0   ;;  %s846_s13 = smov 0   ;;  %s899_s0 = inlined_call_operand.vmem [shape: bf16[4,32,128], index: 0, kind: input, shape index: {}]   ;;  %s900_s1 = inlined_call_operand.vmem [shape: bf16[4,128,128], index: 1, kind: input, shape index: {}]   ;;  %s901_s2 = inlined_call_operand.vmem [shape: bf16[4,32,128], index: 2, kind: output, shape index: {0}]   ;;  %s902_s3 = inlined_call_operand.vmem [shape: f32[4,8,128], index: 3, kind: output, shape index: {1}]  }
   0x1   :  { %s848_s14 = smov 0  }
   0x2 LB: > { %s36_s15 = sadd.s32 1, %s817_s13  ;;  %p692_p0 = scmp.ge.s32.totalorder %s821_s14, 1  ;;  %s821_s14 = sphi %s848_s14, %s14_s14   ;;  %s817_s13 = sphi %s846_s13, %s904_s13   ;;  %s813_s12 = sphi %s844_s12, %s903_s12  }
   0x3   : > { %p38_p1 = scmp.ge.s32.totalorder %s36_s15, 4  ;;  %p206_p2 = scmp.lt.s32.totalorder %s821_s14, 5 }
   0x5   : > { %s906_s15 = smov (%p38_p1, %s36_s15), 0  ;;  %p207_p3 = pnand %p692_p0, %p206_p2 }
   0x6   : > { %p264_p4 = scmp.lt.s32.totalorder (!%p207_p3), %s813_s12, 3  ;;  %v823_v10 = vmov (!%p207_p3), 0.0  }
   0x7   : > { %210 = sbr.rel (%p207_p3) target bundleno = 288 (0x120), region = 28 }
   0xe   : > { %s908_s12 = smov (!%p264_p4, %s813_s12), 3 }
   0xf   : > { %s717_s16 = sshll.u32 %s908_s12, 6  ;;  %s716_s20 = sshll.u32 %s908_s12, 4 }
  0x10   : > { %s287_s19 = scalar_lea.vmem %s900_s1, %s717_s16  ;;  %s274_s23 = scalar_lea.vmem %s899_s0, %s716_s20 }
  0x11   : > { %v789_v0 = vld [vmem:[%s287_s19] sm:$0xff]   ;;  %v790_v1 = vld [vmem:[%s287_s19 + $0x8] sm:$0xff]   ;;  %v791_v2 = vld [vmem:[%s287_s19 + $0x10] sm:$0xff]   ;;  %s699_s24 = sshll.u32 %s908_s12, 3  ;;  %s300_s30 = scalar_lea.vmem %s901_s2, %s716_s20 }
  0x12   : > { %744 = vmatprep.subr.bf16.mxu0 %v789_v0  ;;  %v792_v3 = vld [vmem:[%s287_s19 + $0x18] sm:$0xff]   ;;  %v797_v4 = vld [vmem:[%s274_s23] sm:$0xff]   ;;  %v794_v6 = vld [vmem:[%s287_s19 + $0x28] sm:$0xff]   ;;  %s878_s27 = scalar_lea.vmem %s902_s3, %s699_s24 }
  0x13   : > { %745 = vmatpush3.bf16.msra.mxu0 %v789_v0  ;;  %760 = vmatprep.mubr.bf16.mxu0 %v797_v4  ;;  %v793_v5 = vld [vmem:[%s287_s19 + $0x20] sm:$0xff]   ;;  %v795_v7 = vld [vmem:[%s287_s19 + $0x30] sm:$0xff]   ;;  %v796_v8 = vld [vmem:[%s287_s19 + $0x38] sm:$0xff]   ;;  %323 = vst [vmem:[%s878_s27] sm:$0xff] %v823_v10 }
  0x14   : > { %746 = vmatprep.subr.bf16.mxu0 %v790_v1  ;;  %v798_v9 = vld [vmem:[%s274_s23 + $0x8] sm:$0xff]  }
  0x17   : > { %747 = vmatpush3.bf16.msra.mxu0 %v790_v1 }
  0x18   : > { %748 = vmatprep.subr.bf16.mxu0 %v791_v2 }
  0x1a   : > { %v492_v36 = vld [vmem:[%s878_s27] sm:$0x1]  ;;  %v504_v39 = vld [vmem:[%s878_s27 + $0x1] sm:$0x1] }
  0x1b   : > { %749 = vmatpush3.bf16.msra.mxu0 %v791_v2 }
  0x1c   : > { %750 = vmatprep.subr.bf16.mxu0 %v792_v3 }
  0x1f   : > { %751 = vmatpush3.bf16.msra.mxu0 %v792_v3 }
  0x20   : > { %752 = vmatprep.subr.bf16.mxu0 %v793_v5 }
  0x23   : > { %753 = vmatpush3.bf16.msra.mxu0 %v793_v5 }
  0x24   : > { %754 = vmatprep.subr.bf16.mxu0 %v794_v6 }
  0x27   : > { %755 = vmatpush3.bf16.msra.mxu0 %v794_v6 }
  0x28   : > { %756 = vmatprep.subr.bf16.mxu0 %v795_v7 }
  0x2b   : > { %757 = vmatpush3.bf16.msra.mxu0 %v795_v7 }
  0x2c   : > { %758 = vmatprep.subr.bf16.mxu0 %v796_v8 }
  0x2f   : > { %759 = vmatpush3.bf16.msra.mxu0 %v796_v8 }
  0x32   : > { %761 = vmatmul.mubr.bf16.vlgmr.msra.gmra.mrb[0].mxu0 %v798_v9 }
 0x105   : > { %v762_v11 = vpop.f32.mrb[0].mxu0 }
 0x106   : > { %v442_v12 = vpop.f32.mrb[1].mxu0  ;;  %v507_v20 = vmul.f32 %v762_v11, %v762_v11 }
 0x107   : > { %v763_v13 = vpop.f32.mrb[2].mxu0  ;;  %v505_v16 = vmul.f32 %v442_v12, %v442_v12 }
 0x108   : > { %v731_v14 = vpack.c.bf16 %v763_v13, %v762_v11  ;;  %v445_v15 = vpop.f32.mrb[3].mxu0  ;;  %v508_v23 = vmul.f32 %v763_v13, %v763_v13 }
 0x109   : > { %v726_v17 = vpack.c.bf16 %v445_v15, %v442_v12  ;;  %v493_v18 = vadd.f32 %v445_v15, %v442_v12  ;;  %v506_v19 = vmul.f32 %v445_v15, %v445_v15 }
 0x10a   : > { %733 = vst [vmem:[%s300_s30 + $0x8] sm:$0xff] %v731_v14  }
 0x10b   : > { %727 = vst [vmem:[%s300_s30] sm:$0xff] %v726_v17   ;;  %v494_v21 = vadd.f32 %v762_v11, %v493_v18  ;;  %v509_v22 = vadd.f32 %v506_v19, %v505_v16 }
 0x10d   : > { %v495_v24 = vadd.f32 %v763_v13, %v494_v21  ;;  %v510_v25 = vadd.f32 %v509_v22, %v507_v20 }
 0x10f   : > { %v496_v26 = vrot.slane %v495_v24, 4  ;;  %v511_v27 = vadd.f32 %v510_v25, %v508_v23 }
 0x111   : > { %v497_v28 = vadd.f32 %v496_v26, %v495_v24  ;;  %v512_v29 = vrot.slane %v511_v27, 4 }
 0x113   : > { %v498_v30 = vrot.slane %v497_v28, 2  ;;  %v513_v31 = vadd.f32 %v512_v29, %v511_v27 }
 0x115   : > { %v499_v32 = vadd.f32 %v498_v30, %v497_v28  ;;  %v514_v33 = vrot.slane %v513_v31, 2 }
 0x117   : > { %v500_v34 = vrot.slane %v499_v32, 1  ;;  %v515_v35 = vadd.f32 %v514_v33, %v513_v31 }
 0x119   : > { %v501_v37 = vadd.f32 %v500_v34, %v499_v32  ;;  %v516_v38 = vrot.slane %v515_v35, 1 }
 0x11b   : > { %v502_v40 = vadd.f32 %v501_v37, %v492_v36  ;;  %v517_v41 = vadd.f32 %v516_v38, %v515_v35 }
 0x11d   : > { %503 = vst [vmem:[%s878_s27] sm:$0x1] %v502_v40  ;;  %v518_v42 = vadd.f32 %v517_v41, %v504_v39 }
 0x11f   : > { %519 = vst [vmem:[%s878_s27 + $0x1] sm:$0x1] %v518_v42 }
 0x120 PF: > { %s14_s14 = sadd.s32 1, %s821_s14   ;;  %s903_s12 = smov %s817_s13 }
 0x121   : > { %p11_p5 = scmp.ge.s32.totalorder %s14_s14, 6   ;;  %s904_s13 = smov %s906_s15 }
 0x123   :  { %13 = sbr.rel (!%p11_p5) target bundleno = 2 (0x2), region = 85 }

// kernel: _lambda_.9
= control target key start
LH: loop header
LB: loop body
LE: loop exit
PB: predicated region body
PF: predicated region fallthrough
CT: control target
= control target key end

     0   :  { %9 = vsyncpa [#allocation4], 0  ;;  %s1374_s0 = inlined_call_operand.vmem [shape: bf16[4,128,128], index: 0, kind: input, shape index: {}]   ;;  %s1375_s1 = inlined_call_operand.vmem [shape: bf16[4,128,128], index: 1, kind: input, shape index: {}]   ;;  %s1376_s2 = inlined_call_operand.vmem [shape: f32[4,128,128], index: 2, kind: output, shape index: {0}]   ;;  %s1377_s3 = inlined_call_operand.hbm [shape: f32[4,8,128], index: 3, kind: output, shape index: {1}]  }
   0x1   :  { %11 = vsyncpa [#allocation4 + $0x1], 0  ;;  %s1202_s12 = smov 0   ;;  %s1204_s13 = smov 0  }
   0x2   :  { %s1206_s14 = smov 0   ;;  %s1208_s15 = smov 0  }
   0x3   :  { %s1210_s16 = smov 0   ;;  %s1212_s17 = smov 0  }
   0x4 LB: > { %s897_s18 = sadd.s32 4294967295, %s1178_s17   ;;  %s898_s19 = sadd.s32 4294967294, %s1178_s17   ;;  %s1178_s17 = sphi %s1212_s17, %s17_s17   ;;  %s1174_s16 = sphi %s1210_s16, %s1384_s16   ;;  %s1170_s15 = sphi %s1208_s15, %s1383_s15   ;;  %s1166_s14 = sphi %s1206_s14, %s1382_s14   ;;  %s1162_s13 = sphi %s1204_s13, %s1381_s13   ;;  %s1158_s12 = sphi %s1202_s12, %s1380_s12  }
   0x5   : > { %s39_s20 = sadd.s32 1, %s1174_s16  ;;  %s142_s21 = sadd.s32 1, %s1166_s14 }
   0x6   : > { %p41_p0 = scmp.ge.s32.totalorder %s39_s20, 4  ;;  %p152_p1 = scmp.ne.s32.totalorder %s1166_s14, %s1162_s13 }
   0x7   : > { %p153_p2 = scmp.eq.s32.totalorder %s897_s18, 3  ;;  %p158_p3 = scmp.ne.s32.totalorder %s1162_s13, %s1158_s12 }
   0x8   : > { %s1386_s20 = smov (%p41_p0, %s39_s20), 0  ;;  %p159_p5 = scmp.eq.s32.totalorder %s898_s19, 3 }
   0x9   : > { %p1242_p4 = por %p153_p2, %p152_p1  ;;  %s137_s23 = ssub.s32 %s1174_s16, %s1386_s20 }
   0xa   : > { %p901_p6 = scmp.ge.s32.totalorder %s1178_s17, 1  ;;  %p140_p7 = scmp.eq.s32.totalorder %s137_s23, 0 }
   0xb   : > { %p1249_p8 = por %p159_p5, %p158_p3  ;;  %p209_p9 = scmp.lt.s32.totalorder %s1178_s17, 5 }
   0xc   : > { %s1255_s25 = scalar_select %p140_p7, %s1166_s14, %s142_s21  }
   0xd   : > { %p210_p10 = pnand %p901_p6, %p209_p9 }
   0xe   : > { %p265_p11 = scmp.lt.s32.totalorder (!%p210_p10), %s1170_s15, 3  ;;  %s261_s7 = sand.u32 (!%p210_p10), 1, %s1162_s13   ;;  %v1180_v16 = vmov (!%p210_p10), 0.0  }
   0xf   : > { %213 = sbr.rel (%p210_p10) target bundleno = 345 (0x159), region = 28  ;;  %s902_s8 = sshll.u32 (!%p210_p10), %s261_s7, 3 }
  0x10   : > { %s1291_s9 = scalar_lea.vmem (!%p210_p10), [#allocation3], %s902_s8  ;;  %s926_s21 = sshll.u32 (!%p210_p10), %s1170_s15, 7 }
  0x11   : > { %329 = vst [vmem:[%s1291_s9] sm:$0xff] (!%p210_p10), %v1180_v16  ;;  %s749_s23 = sshll.u32 (!%p210_p10), %s1291_s9, 4  ;;  %s1324_s28 = scalar_lea.hbm (!%p210_p10), %s1377_s3, %s926_s21  ;;  %s1326_s23 = int_to_ptr.vmem [resolvable:$true] %s749_s23 }
  0x12   : > { %s731_s29 = scalar_lea.sflag (!%p210_p10), [#allocation4], %s261_s7 }
  0x16   : > { %s1259_s26 = scalar_select %p265_p11, %s1170_s15, 3 }
  0x17   : > { %s1181_s15 = smov [#allocation3]  }
  0x18   : > { %s929_s27 = sshll.u32 %s1259_s26, 6  ;;  %s931_s10 = sshll.u32 %s1259_s26, 7 }
  0x19   : > { %s1265_s30 = scalar_lea.vmem %s1375_s1, %s929_s27  ;;  %s1273_s6 = scalar_lea.vmem %s1374_s0, %s929_s27 }
  0x1a   : > { %v1052_v0 = vld [vmem:[%s1265_s30] sm:$0xff]   ;;  %v1053_v1 = vld [vmem:[%s1265_s30 + $0x8] sm:$0xff]   ;;  %v1054_v2 = vld [vmem:[%s1265_s30 + $0x10] sm:$0xff]   ;;  %s1298_s19 = scalar_lea.vmem %s1376_s2, %s931_s10  ;;  %s1104_s4 = sshll.u32 %s1181_s15, 4  ;;  %s1105_s4 = int_to_ptr.vmem [resolvable:$false] %s1104_s4 }
  0x1b   : > { %948 = vmatprep.subr.bf16.mxu0 %v1052_v0  ;;  %980 = vmatprep.subr.bf16.mxu1 %v1052_v0  ;;  %v1055_v3 = vld [vmem:[%s1265_s30 + $0x18] sm:$0xff]   ;;  %v1060_v4 = vld [vmem:[%s1273_s6] sm:$0xff]   ;;  %v1057_v7 = vld [vmem:[%s1265_s30 + $0x28] sm:$0xff]   ;;  %s1106_s5 = scalar_lea.vmem %s1105_s4, 256  ;;  %p1107_p1 = scmp.lt.s32.totalorder %s1326_s23, %s1105_s4 }
  0x1c   : > { %949 = vmatpush3.bf16.msra.mxu0 %v1052_v0  ;;  %988 = vmatpush3.bf16.msra.mxu1 %v1052_v0  ;;  %v1056_v5 = vld [vmem:[%s1265_s30 + $0x20] sm:$0xff]   ;;  %v1058_v8 = vld [vmem:[%s1265_s30 + $0x30] sm:$0xff]   ;;  %v1059_v9 = vld [vmem:[%s1265_s30 + $0x38] sm:$0xff]   ;;  %s1100_s30 = scalar_lea.vmem %s1326_s23, 128 }
  0x1d   : > { %950 = vmatprep.subr.bf16.mxu0 %v1053_v1  ;;  %981 = vmatprep.subr.bf16.mxu1 %v1053_v1  ;;  %v1064_v6 = vld [vmem:[%s1273_s6 + $0x20] sm:$0xff]   ;;  %v1061_v10 = vld [vmem:[%s1273_s6 + $0x8] sm:$0xff]   ;;  %v1062_v12 = vld [vmem:[%s1273_s6 + $0x10] sm:$0xff]   ;;  %p1101_p12 = scmp.ne.s32.totalorder %s1326_s23, %s1100_s30  ;;  %p1108_p2 = scmp.lt.s32.totalorder %s1106_s5, %s1100_s30 }
  0x1e   : > { %964 = vmatprep.mubr.bf16.mxu0 %v1060_v4  ;;  %972 = vmatprep.mubr.bf16.mxu1 %v1064_v6  ;;  %v1065_v11 = vld [vmem:[%s1273_s6 + $0x28] sm:$0xff]   ;;  %v1066_v13 = vld [vmem:[%s1273_s6 + $0x30] sm:$0xff]   ;;  %v1063_v14 = vld [vmem:[%s1273_s6 + $0x18] sm:$0xff]  }
  0x1f   : > { %v1067_v15 = vld [vmem:[%s1273_s6 + $0x38] sm:$0xff]   ;;  %p1102_p13 = pnand %p1101_p12, %p1242_p4  ;;  %p1109_p3 = por %p1108_p2, %p1107_p1 }
  0x20   : > { %951 = vmatpush3.bf16.msra.mxu0 %v1053_v1  ;;  %989 = vmatpush3.bf16.msra.mxu1 %v1053_v1 }
  0x21   : > { %952 = vmatprep.subr.bf16.mxu0 %v1054_v2  ;;  %982 = vmatprep.subr.bf16.mxu1 %v1054_v2  ;;  %p1103_p0 = pneg %p1102_p13 }
  0x23   : > { %p1110_p5 = pnand %p1109_p3, %p1103_p0 }
  0x24   : > { %953 = vmatpush3.bf16.msra.mxu0 %v1054_v2  ;;  %990 = vmatpush3.bf16.msra.mxu1 %v1054_v2 }
  0x25   : > { %954 = vmatprep.subr.bf16.mxu0 %v1055_v3  ;;  %983 = vmatprep.subr.bf16.mxu1 %v1055_v3 }
  0x28   : > { %955 = vmatpush3.bf16.msra.mxu0 %v1055_v3  ;;  %991 = vmatpush3.bf16.msra.mxu1 %v1055_v3 }
  0x29   : > { %956 = vmatprep.subr.bf16.mxu0 %v1056_v5  ;;  %984 = vmatprep.subr.bf16.mxu1 %v1056_v5 }
  0x2c   : > { %957 = vmatpush3.bf16.msra.mxu0 %v1056_v5  ;;  %992 = vmatpush3.bf16.msra.mxu1 %v1056_v5 }
  0x2d   : > { %958 = vmatprep.subr.bf16.mxu0 %v1057_v7  ;;  %985 = vmatprep.subr.bf16.mxu1 %v1057_v7 }
  0x30   : > { %959 = vmatpush3.bf16.msra.mxu0 %v1057_v7  ;;  %993 = vmatpush3.bf16.msra.mxu1 %v1057_v7 }
  0x31   : > { %960 = vmatprep.subr.bf16.mxu0 %v1058_v8  ;;  %986 = vmatprep.subr.bf16.mxu1 %v1058_v8 }
  0x34   : > { %961 = vmatpush3.bf16.msra.mxu0 %v1058_v8  ;;  %994 = vmatpush3.bf16.msra.mxu1 %v1058_v8 }
  0x35   : > { %962 = vmatprep.subr.bf16.mxu0 %v1059_v9  ;;  %987 = vmatprep.subr.bf16.mxu1 %v1059_v9 }
  0x38   : > { %963 = vmatpush3.bf16.msra.mxu0 %v1059_v9  ;;  %995 = vmatpush3.bf16.msra.mxu1 %v1059_v9 }
  0x3b   : > { %965 = vmatmul.mubr.bf16.vlgmr.msra.gmra.mrb[0].mxu0 %v1061_v10  ;;  %973 = vmatmul.mubr.bf16.vlgmr.msra.gmra.mrb[0].mxu1 %v1065_v11 }
  0x3c   : > { %968 = vmatprep.mubr.bf16.mxu0 %v1062_v12  ;;  %976 = vmatprep.mubr.bf16.mxu1 %v1066_v13 }
  0x43   : > { %969 = vmatmul.mubr.bf16.gmra.mrb[4].mxu0 %v1063_v14  ;;  %977 = vmatmul.mubr.bf16.gmra.mrb[4].mxu1 %v1067_v15 }
 0x10e   : > { %v966_v17 = vpop.f32.mrb[0].mxu0  ;;  %v974_v18 = vpop.f32.mrb[0].mxu1 }
 0x10f   : > { %1068 = vtanh.f32 %v966_v17  ;;  %v508_v19 = vpop.f32.mrb[1].mxu0  ;;  %v540_v20 = vpop.f32.mrb[1].mxu1 }
 0x110   : > { %1070 = vtanh.f32 %v508_v19  ;;  %v967_v21 = vpop.f32.mrb[2].mxu0  ;;  %v975_v22 = vpop.f32.mrb[2].mxu1 }
 0x111   : > { %1072 = vtanh.f32 %v967_v21  ;;  %v511_v23 = vpop.f32.mrb[3].mxu0  ;;  %v543_v24 = vpop.f32.mrb[3].mxu1 }
 0x112   : > { %1074 = vtanh.f32 %v511_v23 }
 0x113   : > { %1076 = vtanh.f32 %v974_v18 }
 0x114   : > { %1078 = vtanh.f32 %v540_v20 }
 0x115   : > { %1080 = vtanh.f32 %v975_v22 }
 0x116   : > { %v970_v25 = vpop.f32.mrb[4].mxu0  ;;  %1082 = vtanh.f32 %v543_v24  ;;  %v978_v26 = vpop.f32.mrb[4].mxu1 }
 0x117   : > { %1084 = vtanh.f32 %v970_v25  ;;  %v524_v27 = vpop.f32.mrb[5].mxu0  ;;  %v556_v28 = vpop.f32.mrb[5].mxu1 }
 0x118   : > { %1086 = vtanh.f32 %v524_v27  ;;  %v971_v29 = vpop.f32.mrb[6].mxu0  ;;  %v979_v30 = vpop.f32.mrb[6].mxu1 }
 0x119   : > { %v1069_v31 = vpop.eup %1068  ;;  %1088 = vtanh.f32 %v971_v29  ;;  %v527_v32 = vpop.f32.mrb[7].mxu0 }
 0x11a   : > { %v559_v33 = vpop.f32.mrb[7].mxu1  ;;  %v1071_v34 = vpop.eup %1070  ;;  %640 = vst [vmem:[%s1298_s19 + $0x10] sm:$0xff] %v1069_v31  ;;  %1090 = vtanh.f32 %v527_v32  ;;  %v681_v43 = vmul.f32 %v1069_v31, %v1069_v31 }
 0x11b   : > { %v1073_v35 = vpop.eup %1072  ;;  %638 = vst [vmem:[%s1298_s19] sm:$0xff] %v1071_v34  ;;  %1092 = vtanh.f32 %v978_v26  ;;  %v679_v38 = vmul.f32 %v1071_v34, %v1071_v34 }
 0x11c   : > { %v1075_v36 = vpop.eup %1074  ;;  %641 = vst [vmem:[%s1298_s19 + $0x18] sm:$0xff] %v1073_v35  ;;  %1094 = vtanh.f32 %v556_v28  ;;  %v682_v48 = vmul.f32 %v1073_v35, %v1073_v35 }
 0x11d   : > { %v1077_v37 = vpop.eup %1076  ;;  %639 = vst [vmem:[%s1298_s19 + $0x8] sm:$0xff] %v1075_v36  ;;  %v655_v39 = vadd.f32 %v1075_v36, %v1071_v34  ;;  %v680_v40 = vmul.f32 %v1075_v36, %v1075_v36  ;;  %1096 = vtanh.f32 %v979_v30 }
 0x11e   : > { %v1079_v41 = vpop.eup %1078  ;;  %648 = vst [vmem:[%s1298_s19 + $0x50] sm:$0xff] %v1077_v37  ;;  %1098 = vtanh.f32 %v559_v33  ;;  %v689_v12 = vmul.f32 %v1077_v37, %v1077_v37 }
 0x11f   : > { %v1081_v42 = vpop.eup %1080  ;;  %v656_v44 = vadd.f32 %v1069_v31, %v655_v39  ;;  %v695_v45 = vadd.f32 %v680_v40, %v679_v38  ;;  %646 = vst [vmem:[%s1298_s19 + $0x40] sm:$0xff] %v1079_v41  ;;  %v687_v6 = vmul.f32 %v1079_v41, %v1079_v41  ;;  %v654_v40 = vld [vmem:[%s1291_s9] sm:$0x1] }
 0x120   : > { %v1083_v46 = vpop.eup %1082  ;;  %649 = vst [vmem:[%s1298_s19 + $0x58] sm:$0xff] %v1081_v42  ;;  %v690_v15 = vmul.f32 %v1081_v42, %v1081_v42 }
 0x121   : > { %v1085_v47 = vpop.eup %1084  ;;  %v696_v49 = vadd.f32 %v695_v45, %v681_v43  ;;  %v657_v50 = vadd.f32 %v1073_v35, %v656_v44  ;;  %647 = vst [vmem:[%s1298_s19 + $0x48] sm:$0xff] %v1083_v46  ;;  %v688_v11 = vmul.f32 %v1083_v46, %v1083_v46  ;;  %v678_v43 = vld [vmem:[%s1291_s9 + $0x1] sm:$0x1] }
 0x122   : > { %v1087_v51 = vpop.eup %1086  ;;  %644 = vst [vmem:[%s1298_s19 + $0x30] sm:$0xff] %v1085_v47  ;;  %v685_v63 = vmul.f32 %v1085_v47, %v1085_v47 }
 0x123   : > { %v1089_v52 = vpop.eup %1088  ;;  %642 = vst [vmem:[%s1298_s19 + $0x20] sm:$0xff] %v1087_v51  ;;  %v658_v53 = vadd.f32 %v1087_v51, %v657_v50  ;;  %v683_v54 = vmul.f32 %v1087_v51, %v1087_v51  ;;  %v697_v55 = vadd.f32 %v696_v49, %v682_v48 }
 0x124   : > { %v1091_v56 = vpop.eup %1090  ;;  %645 = vst [vmem:[%s1298_s19 + $0x38] sm:$0xff] %v1089_v52  ;;  %v686_v3 = vmul.f32 %v1089_v52, %v1089_v52 }
 0x125   : > { %v1093_v57 = vpop.eup %1092  ;;  %v698_v58 = vadd.f32 %v697_v55, %v683_v54  ;;  %643 = vst [vmem:[%s1298_s19 + $0x28] sm:$0xff] %v1091_v56  ;;  %v659_v59 = vadd.f32 %v1091_v56, %v658_v53  ;;  %v684_v60 = vmul.f32 %v1091_v56, %v1091_v56 }
 0x126   : > { %v1095_v61 = vpop.eup %1094  ;;  %652 = vst [vmem:[%s1298_s19 + $0x70] sm:$0xff] %v1093_v57  ;;  %v693_v24 = vmul.f32 %v1093_v57, %v1093_v57 }
 0x127   : > { %v1097_v62 = vpop.eup %1096  ;;  %v660_v0 = vadd.f32 %v1085_v47, %v659_v59  ;;  %v699_v1 = vadd.f32 %v698_v58, %v684_v60  ;;  %650 = vst [vmem:[%s1298_s19 + $0x60] sm:$0xff] %v1095_v61  ;;  %v691_v18 = vmul.f32 %v1095_v61, %v1095_v61 }
 0x128   : > { %v1099_v2 = vpop.eup %1098  ;;  %653 = vst [vmem:[%s1298_s19 + $0x78] sm:$0xff] %v1097_v62  ;;  %v694_v28 = vmul.f32 %v1097_v62, %v1097_v62 }
 0x129   : > { %v700_v4 = vadd.f32 %v699_v1, %v685_v63  ;;  %v661_v5 = vadd.f32 %v1089_v52, %v660_v0  ;;  %651 = vst [vmem:[%s1298_s19 + $0x68] sm:$0xff] %v1099_v2  ;;  %v692_v23 = vmul.f32 %v1099_v2, %v1099_v2 }
 0x12b   : > { %v662_v7 = vadd.f32 %v1079_v41, %v661_v5  ;;  %v701_v8 = vadd.f32 %v700_v4, %v686_v3 }
 0x12d   : > { %v702_v9 = vadd.f32 %v701_v8, %v687_v6  ;;  %v663_v10 = vadd.f32 %v1083_v46, %v662_v7 }
 0x12f   : > { %v664_v13 = vadd.f32 %v1077_v37, %v663_v10  ;;  %v703_v14 = vadd.f32 %v702_v9, %v688_v11 }
 0x131   : > { %v704_v16 = vadd.f32 %v703_v14, %v689_v12  ;;  %v665_v17 = vadd.f32 %v1081_v42, %v664_v13 }
 0x133   : > { %v666_v19 = vadd.f32 %v1095_v61, %v665_v17  ;;  %v705_v20 = vadd.f32 %v704_v16, %v690_v15 }
 0x135   : > { %v706_v21 = vadd.f32 %v705_v20, %v691_v18  ;;  %v667_v22 = vadd.f32 %v1099_v2, %v666_v19 }
 0x137   : > { %v668_v25 = vadd.f32 %v1093_v57, %v667_v22  ;;  %v707_v26 = vadd.f32 %v706_v21, %v692_v23 }
 0x139   : > { %v669_v27 = vadd.f32 %v1097_v62, %v668_v25  ;;  %v708_v29 = vadd.f32 %v707_v26, %v693_v24 }
 0x13b   : > { %v670_v30 = vrot.slane %v669_v27, 4  ;;  %v709_v31 = vadd.f32 %v708_v29, %v694_v28 }
 0x13d   : > { %v671_v32 = vadd.f32 %v670_v30, %v669_v27  ;;  %v710_v33 = vrot.slane %v709_v31, 4 }
 0x13f   : > { %v672_v34 = vrot.slane %v671_v32, 2  ;;  %v711_v35 = vadd.f32 %v710_v33, %v709_v31 }
 0x141   : > { %v673_v36 = vadd.f32 %v672_v34, %v671_v32  ;;  %v712_v37 = vrot.slane %v711_v35, 2 }
 0x143   : > { %v674_v38 = vrot.slane %v673_v36, 1  ;;  %v713_v39 = vadd.f32 %v712_v37, %v711_v35 }
 0x145   : > { %v675_v41 = vadd.f32 %v674_v38, %v673_v36  ;;  %v714_v42 = vrot.slane %v713_v39, 1 }
 0x147   : > { %v676_v44 = vadd.f32 %v675_v41, %v654_v40  ;;  %v715_v45 = vadd.f32 %v714_v42, %v713_v39 }
 0x149   : > { %677 = vst [vmem:[%s1291_s9] sm:$0x1] %v676_v44  ;;  %v716_v46 = vadd.f32 %v715_v45, %v678_v43 }
 0x14b   : > { %717 = vst [vmem:[%s1291_s9 + $0x1] sm:$0x1] %v716_v46 }
 0x14c   : > { %1113 = shalt.err (!%p1110_p5)
}
 0x14d   : > { %s1114_s6 = scalar_lea.hbm %s1324_s28, 128  ;;  %s1118_s9 = scalar_lea.hbm %s1377_s3, 512 }
 0x14e   : > { %p1115_p6 = scmp.ne.s32.totalorder %s1324_s28, %s1114_s6  ;;  %p1119_p10 = scmp.lt.u32.totalorder %s1324_s28, %s1377_s3 }
 0x14f   : > { %p1120_p11 = scmp.lt.u32.totalorder %s1118_s9, %s1114_s6  ;;  %p1122_p13 = scmp.lt.u32.totalorder %s1114_s6, %s1324_s28 }
 0x150   : > { %p1116_p7 = pnand %p1115_p6, %p1242_p4 }
 0x151   : > { %p1121_p12 = por %p1120_p11, %p1119_p10 }
 0x152   : > { %p1117_p9 = pneg %p1116_p7 }
 0x153   : > { %p1123_p0 = por %p1122_p13, %p1121_p12 }
 0x155   : > { %p1124_p1 = pnand %p1123_p0, %p1117_p9 }
 0x157   : > { %1127 = shalt.err (!%p1124_p1)
}
 0x158   : > { %996 = dma.vmem_to_hbm [thread:$0]  (%p1242_p4), %s1326_s23, 128, %s1324_s28, %s731_s29  }
 0x159 PF: > { %p1002_p2 = scmp.ge.s32.totalorder %s1178_s17, 2  ;;  %s776_s18 = sand.u32 1, %s1158_s12  }
 0x15a   : > { %s777_s19 = scalar_lea.sflag [#allocation4], %s776_s18 }
 0x15b   : > { %p999_p3 = pnand %p1002_p2, %p1249_p8 }
 0x15d   : > { %1153 = dma.done.wait (!%p999_p3), %s777_s19, 128  }
 0x15e   : > { %1155 = vsyncadd (!%p999_p3), %s777_s19, 4294967168  ;;  %s17_s17 = sadd.s32 1, %s1178_s17   ;;  %s1380_s12 = smov %s1162_s13 }
 0x15f   : > { %p14_p5 = scmp.ge.s32.totalorder %s17_s17, 6   ;;  %s1381_s13 = smov %s1166_s14 }
 0x160   : > { %s1382_s14 = smov %s1255_s25  ;;  %s1383_s15 = smov %s1174_s16 }
 0x161   : > { %s1384_s16 = smov %s1386_s20  ;;  %16 = sbr.rel (!%p14_p5) target bundleno = 4 (0x4), region = 90 }
 0x168   :  { %782 = vsyncpa [#allocation4], 1 }
 0x169   :  { %784 = vsyncpa [#allocation4 + $0x1], 1 }

</bundles_post_ra>
